<compile_context>
chip_gen: v7x
topology: tpu7x:2x2x1
jax: 0.10.0
libtpu: 0.0.40
codegen_flags: <defaults>
</compile_context>

<pallas_src>
import jax
import jax.numpy as jnp
from jax.experimental import pallas as pl
from jax.experimental.pallas import tpu as pltpu


# --------------------------------------------------------------------------- #
# Kernel
# --------------------------------------------------------------------------- #
def _distillery_kernel(xT_ref,     # (obs, TB)  f32   x^T, batch on lanes
                       w1_ref,     # (hid, obs) f32   ref layer-1 weight (out,in)
                       b1_ref,     # (hid, 1)   f32
                       w2_ref,     # (hid, hid) bf16  ref layer-2 weight (out,in)
                       b2_ref,     # (hid, 1)   f32
                       w3_ref,     # (hid, 1)   f32   ref layer-3 weight (column)
                       wt_ref,     # (obs, 1)   f32   trn weight (column)
                       btail_ref,  # SMEM (2,)  f32   [b3, bt]
                       out_ref):   # (2, TB)    f32   row0 = ref, row1 = trn
    xT = xT_ref[...]
    obs = xT.shape[0]

    # ---- ref layer 1: relu(W1 @ x^T + b1).  K = obs is tiny -> VPU rank-1
    # updates instead of wasting >98% of the MXU's K dimension.  f32.
    h1 = b1_ref[...] + w1_ref[:, 0:1] * xT[0:1, :]              # (hid, TB)
    for k in range(1, obs):                                     # static unroll
        h1 = h1 + w1_ref[:, k:k + 1] * xT[k:k + 1, :]
    h1 = jnp.maximum(h1, 0.0)

    # ---- ref layer 2: the only real matmul.  bf16 operands, f32 accumulate.
    h2 = jnp.dot(w2_ref[...], h1.astype(jnp.bfloat16),
                 preferred_element_type=jnp.float32) + b2_ref[...]
    h2 = jnp.maximum(h2, 0.0)                                   # (hid, TB) f32

    # ---- ref layer 3 (N = 1): VPU multiply + XLU sublane reduce, f32.
    ref_t = jnp.sum(h2 * w3_ref[...], axis=0, keepdims=True) + btail_ref[0]

    # ---- trn net (K = obs, N = 1): pure VPU, f32.
    trn_t = jnp.sum(xT * wt_ref[...], axis=0, keepdims=True) + btail_ref[1]

    # single fused lane-dense store of both heads
    out_ref[...] = jnp.concatenate([ref_t, trn_t], axis=0)      # (2, TB)


# --------------------------------------------------------------------------- #
# Generation-aware tiling helpers
# --------------------------------------------------------------------------- #
def _tpu_generation():
    """Coarse TPU generation: 'v7x' (2 TCs/chip), 'v5e' (tight scoped VMEM /
    older single-TC chips), or 'v6e' (everything else / unknown)."""
    try:
        kind = jax.devices()[0].device_kind.lower()
    except Exception:
        return "v6e"
    if "7" in kind:
        return "v7x"
    if ("v5" in kind) or ("v4" in kind) or ("v3" in kind) or ("v2" in kind):
        return "v5e"
    return "v6e"


def _pad_batch(B, gen):
    """Padded batch: multiple of 128 (lane width); on v7x prefer a multiple of
    256 so the grid can be split evenly across both TensorCores."""
    gran = 256 if (gen == "v7x" and B > 128) else 128
    return max(128, ((B + gran - 1) // gran) * gran)


def _choose_batch_tile(b_pad, gen):
    """Lane-aligned (multiple of 128) batch tile.

    v5e/v6e (single TC): largest tile that fits comfortably in scoped VMEM
    (single grid step when possible -- extra steps are pure overhead).
    v7x (2 TCs): an EVEN number of grid steps so both cores stay balanced.
    """
    if gen == "v7x" and b_pad > 128:
        cap = 4096
        start = (min(cap, b_pad // 2) // 128) * 128
        for t in range(start, 127, -128):
            if b_pad % t == 0 and (b_pad // t) % 2 == 0:
                return t
        return 128
    cap = 2048 if gen == "v5e" else 4096
    if b_pad <= cap:
        return b_pad
    for t in range(cap, 127, -128):
        if b_pad % t == 0:
            return t
    return 128


# --------------------------------------------------------------------------- #
# Wrapper
# --------------------------------------------------------------------------- #
def mountain_car_distillery_forward(x, params, *, batch_tile=None):
    """x: (B, obs) f32.  Returns (ref, trn), each (B, 1) f32 -- matches
    MountainCarNetDistillery.forward."""
    B, obs = x.shape
    hid = params["w1"].shape[0]
    gen = _tpu_generation()

    b_pad = _pad_batch(B, gen)
    tb = _choose_batch_tile(b_pad, gen) if batch_tile is None else batch_tile
    assert b_pad % tb == 0 and tb % 128 == 0
    grid = (b_pad // tb,)

    # Batch on the lane axis; zero-pad columns up to b_pad (lane-dense blocks).
    xT = jnp.transpose(x).astype(jnp.float32)                   # (obs, B)
    if b_pad != B:
        xT = jnp.pad(xT, ((0, 0), (0, b_pad - B)))

    w2_bf16 = params["w2"].astype(jnp.bfloat16)                 # MXU-native dtype
    b_tail = jnp.concatenate([params["b3"].reshape(1),
                              params["bt"].reshape(1)]).astype(jnp.float32)

    batch_map = lambda i: (0, i)
    fixed_map = lambda i: (0, 0)

    def build(semantics, single_buffer_weights):
        if single_buffer_weights:
            w_spec = lambda shape: pl.BlockSpec(shape, fixed_map,
                                                pipeline_mode=pl.Buffered(1))
        else:
            w_spec = lambda shape: pl.BlockSpec(shape, fixed_map)
        in_specs = [
            pl.BlockSpec((obs, tb), batch_map),                 # x^T (pipelined)
            w_spec((hid, obs)),                                 # w1
            w_spec((hid, 1)),                                   # b1
            w_spec((hid, hid)),                                 # w2 (bf16)
            w_spec((hid, 1)),                                   # b2
            w_spec((hid, 1)),                                   # w3 column
            w_spec((obs, 1)),                                   # wt column
            pl.BlockSpec(memory_space=pltpu.MemorySpace.SMEM),  # [b3, bt]
        ]
        out_specs = pl.BlockSpec((2, tb), batch_map)
        return pl.pallas_call(
            _distillery_kernel,
            grid=grid,
            in_specs=in_specs,
            out_specs=out_specs,
            out_shape=jax.ShapeDtypeStruct((2, b_pad), jnp.float32),
            compiler_params=pltpu.CompilerParams(
                dimension_semantics=semantics,
                vmem_limit_bytes=32 * 1024 * 1024),
        )

    # Preferred configs first; conservative fallbacks keep the script runnable
    # on any TPU generation / jax build.
    attempts = []
    core_parallel = getattr(pltpu, "CORE_PARALLEL", None)
    if gen == "v7x" and core_parallel is not None:
        attempts.append(((core_parallel,), True))
    attempts.append((("parallel",), True))
    attempts.append((("parallel",), False))
    attempts.append((("arbitrary",), False))

    args = (xT, params["w1"], params["b1"], w2_bf16, params["b2"],
            params["w3"], params["wt"], b_tail)

    out_t = None
    last_err = None
    for semantics, single_buf in attempts:
        try:
            out_t = build(semantics, single_buf)(*args)
            break
        except Exception as e:          # fall back to a more conservative config
            last_err = e
    if out_t is None:
        raise last_err

    ref = jnp.transpose(out_t[0:1, :B])                         # (B, 1)
    trn = jnp.transpose(out_t[1:2, :B])                         # (B, 1)
    return ref, trn


# --------------------------------------------------------------------------- #
# Parameters / pure-JAX reference
# --------------------------------------------------------------------------- #
def init_params(key, obs_size, hid_size=128):
    """Deterministic synthetic init (PyTorch-style U(-1/sqrt(in), 1/sqrt(in)))."""
    ks = jax.random.split(key, 8)
    s1 = 1.0 / jnp.sqrt(obs_size)
    s2 = 1.0 / jnp.sqrt(hid_size)
    u = jax.random.uniform
    return {
        "w1": u(ks[0], (hid_size, obs_size), jnp.float32, -s1, s1),  # (out, in)
        "b1": u(ks[1], (hid_size, 1), jnp.float32, -s1, s1),
        "w2": u(ks[2], (hid_size, hid_size), jnp.float32, -s2, s2),  # (out, in)
        "b2": u(ks[3], (hid_size, 1), jnp.float32, -s2, s2),
        "w3": u(ks[4], (hid_size, 1), jnp.float32, -s2, s2),         # (1,hid)^T
        "b3": u(ks[5], (1,), jnp.float32, -s2, s2),
        "wt": u(ks[6], (obs_size, 1), jnp.float32, -s1, s1),         # (1,obs)^T
        "bt": u(ks[7], (1,), jnp.float32, -s1, s1),
    }


def _reference_forward(x, p):
    h = jnp.maximum(x @ p["w1"].T + p["b1"].T, 0.0)
    h = jnp.maximum(h @ p["w2"].T + p["b2"].T, 0.0)
    ref = h @ p["w3"] + p["b3"]
    trn = x @ p["wt"] + p["bt"]
    return ref, trn


# --------------------------------------------------------------------------- #
# Self-test
# --------------------------------------------------------------------------- #
if __name__ == "__main__":
    key = jax.random.PRNGKey(0)
    k_x, k_p = jax.random.split(key)

    obs_size = 2      # MountainCar observation: (position, velocity)
    hid_size = 128
    batch = 8         # small RL batch; padded to 128 lanes inside the wrapper

    x = jax.random.normal(k_x, (batch, obs_size), dtype=jnp.float32)
    params = init_params(k_p, obs_size, hid_size)

    ref_out, trn_out = mountain_car_distillery_forward(x, params)
    jax.block_until_ready((ref_out, trn_out))

    # sanity check against plain-JAX reference
    ref_exp, trn_exp = _reference_forward(x, params)
    assert ref_out.shape == (batch, 1) and trn_out.shape == (batch, 1)
    # trn head is pure f32 -> tight tolerance; ref head uses bf16 MXU operands
    # (f32 accumulation) -> loosened tolerance.
    assert jnp.allclose(trn_out, trn_exp, atol=1e-5), "trn_net mismatch"
    assert jnp.allclose(ref_out, ref_exp, atol=5e-2, rtol=5e-2), "ref_net mismatch"

    print("KERNEL_OK")
</pallas_src>

<mosaic_0001>
module attributes {stable_mosaic.version = 11 : i64} {
  func.func @_distillery_kernel(%arg0: i32, %arg1: memref<2x128xf32, #tpu.memory_space<vmem>>, %arg2: memref<128x2xf32, #tpu.memory_space<vmem>>, %arg3: memref<128x1xf32, #tpu.memory_space<vmem>>, %arg4: memref<128x128xbf16, #tpu.memory_space<vmem>>, %arg5: memref<128x1xf32, #tpu.memory_space<vmem>>, %arg6: memref<128x1xf32, #tpu.memory_space<vmem>>, %arg7: memref<2x1xf32, #tpu.memory_space<vmem>>, %arg8: memref<2xf32, #tpu.memory_space<smem>>, %arg9: memref<2x128xf32, #tpu.memory_space<vmem>>) attributes {dimension_semantics = [#tpu.dimension_semantics<parallel>], iteration_bounds = array<i64: 1>, scalar_prefetch = 0 : i64, scratch_operands = 0 : i64, tpu.core_type = #tpu.core_type<tc>, window_params = [{transform_indices = @transform_0, window_bounds = array<i64: 2, 128>}, {pipeline_mode = #tpu.pipeline_mode<synchronous>, transform_indices = @transform_1, window_bounds = array<i64: 128, 2>}, {pipeline_mode = #tpu.pipeline_mode<synchronous>, transform_indices = @transform_2, window_bounds = array<i64: 128, 1>}, {pipeline_mode = #tpu.pipeline_mode<synchronous>, transform_indices = @transform_3, window_bounds = array<i64: 128, 128>}, {pipeline_mode = #tpu.pipeline_mode<synchronous>, transform_indices = @transform_4, window_bounds = array<i64: 128, 1>}, {pipeline_mode = #tpu.pipeline_mode<synchronous>, transform_indices = @transform_5, window_bounds = array<i64: 128, 1>}, {pipeline_mode = #tpu.pipeline_mode<synchronous>, transform_indices = @transform_6, window_bounds = array<i64: 2, 1>}, {transform_indices = @transform_7, window_bounds = array<i64: 2>}, {transform_indices = @transform_8, window_bounds = array<i64: 2, 128>}]} {
    %c0 = arith.constant 0 : index
    %c0_0 = arith.constant 0 : index
    %0 = vector.load %arg1[%c0, %c0_0] : memref<2x128xf32, #tpu.memory_space<vmem>>, vector<2x128xf32>
    %c0_1 = arith.constant 0 : index
    %c0_2 = arith.constant 0 : index
    %1 = vector.load %arg3[%c0_1, %c0_2] : memref<128x1xf32, #tpu.memory_space<vmem>>, vector<128x1xf32>
    %c0_3 = arith.constant 0 : index
    %c0_4 = arith.constant 0 : index
    %2 = vector.load %arg2[%c0_3, %c0_4] : memref<128x2xf32, #tpu.memory_space<vmem>>, vector<128x1xf32>
    %3 = vector.extract_strided_slice %0 {offsets = [0, 0], sizes = [1, 128], strides = [1, 1]} : vector<2x128xf32> to vector<1x128xf32>
    %4 = vector.broadcast %2 : vector<128x1xf32> to vector<128x128xf32>
    %5 = vector.broadcast %3 : vector<1x128xf32> to vector<128x128xf32>
    %6 = arith.mulf %4, %5 : vector<128x128xf32>
    %7 = vector.broadcast %1 : vector<128x1xf32> to vector<128x128xf32>
    %8 = arith.addf %7, %6 : vector<128x128xf32>
    %c0_5 = arith.constant 0 : index
    %c1 = arith.constant 1 : index
    %9 = vector.load %arg2[%c0_5, %c1] : memref<128x2xf32, #tpu.memory_space<vmem>>, vector<128x1xf32>
    %10 = vector.extract_strided_slice %0 {offsets = [1, 0], sizes = [1, 128], strides = [1, 1]} : vector<2x128xf32> to vector<1x128xf32>
    %11 = vector.broadcast %9 : vector<128x1xf32> to vector<128x128xf32>
    %12 = vector.broadcast %10 : vector<1x128xf32> to vector<128x128xf32>
    %13 = arith.mulf %11, %12 : vector<128x128xf32>
    %14 = arith.addf %8, %13 : vector<128x128xf32>
    %cst = arith.constant 0.000000e+00 : f32
    %15 = vector.broadcast %cst : f32 to vector<128x128xf32>
    %16 = arith.maximumf %14, %15 : vector<128x128xf32>
    %c0_6 = arith.constant 0 : index
    %c0_7 = arith.constant 0 : index
    %17 = vector.load %arg4[%c0_6, %c0_7] : memref<128x128xbf16, #tpu.memory_space<vmem>>, vector<128x128xbf16>
    %18 = arith.truncf %16 : vector<128x128xf32> to vector<128x128xbf16>
    %cst_8 = arith.constant dense<0.000000e+00> : vector<128x128xf32>
    %19 = tpu.matmul %17, %18, %cst_8 {dimension_numbers = #tpu.dot_dimension_numbers<[1], [0], [0], [1], [0, 0, 1, 1], [], []>} : vector<128x128xbf16>, vector<128x128xbf16>, vector<128x128xf32> -> vector<128x128xf32>
    %c0_9 = arith.constant 0 : index
    %c0_10 = arith.constant 0 : index
    %20 = vector.load %arg5[%c0_9, %c0_10] : memref<128x1xf32, #tpu.memory_space<vmem>>, vector<128x1xf32>
    %21 = vector.broadcast %20 : vector<128x1xf32> to vector<128x128xf32>
    %22 = arith.addf %19, %21 : vector<128x128xf32>
    %cst_11 = arith.constant 0.000000e+00 : f32
    %23 = vector.broadcast %cst_11 : f32 to vector<128x128xf32>
    %24 = arith.maximumf %22, %23 : vector<128x128xf32>
    %c0_12 = arith.constant 0 : index
    %c0_13 = arith.constant 0 : index
    %25 = vector.load %arg6[%c0_12, %c0_13] : memref<128x1xf32, #tpu.memory_space<vmem>>, vector<128x1xf32>
    %26 = vector.broadcast %25 : vector<128x1xf32> to vector<128x128xf32>
    %27 = arith.mulf %24, %26 : vector<128x128xf32>
    %cst_14 = arith.constant dense<0.000000e+00> : vector<128xf32>
    %28 = vector.multi_reduction <add>, %27, %cst_14 [0] : vector<128x128xf32> to vector<128xf32>
    %29 = vector.shape_cast %28 : vector<128xf32> to vector<1x128xf32>
    %c0_15 = arith.constant 0 : index
    %30 = memref.load %arg8[%c0_15] : memref<2xf32, #tpu.memory_space<smem>>
    %31 = vector.broadcast %30 : f32 to vector<1x128xf32>
    %32 = arith.addf %29, %31 : vector<1x128xf32>
    %c0_16 = arith.constant 0 : index
    %c0_17 = arith.constant 0 : index
    %33 = vector.load %arg7[%c0_16, %c0_17] : memref<2x1xf32, #tpu.memory_space<vmem>>, vector<2x1xf32>
    %34 = vector.broadcast %33 : vector<2x1xf32> to vector<2x128xf32>
    %35 = arith.mulf %0, %34 : vector<2x128xf32>
    %cst_18 = arith.constant dense<0.000000e+00> : vector<128xf32>
    %36 = vector.multi_reduction <add>, %35, %cst_18 [0] : vector<2x128xf32> to vector<128xf32>
    %37 = vector.shape_cast %36 : vector<128xf32> to vector<1x128xf32>
    %c1_19 = arith.constant 1 : index
    %38 = memref.load %arg8[%c1_19] : memref<2xf32, #tpu.memory_space<smem>>
    %39 = vector.broadcast %38 : f32 to vector<1x128xf32>
    %40 = arith.addf %37, %39 : vector<1x128xf32>
    %41 = tpu.concatenate %32, %40 in 0 : vector<1x128xf32>, vector<1x128xf32> -> vector<2x128xf32>
    %c0_20 = arith.constant 0 : index
    %c0_21 = arith.constant 0 : index
    %42 = vector.load %arg9[%c0_20, %c0_21] : memref<2x128xf32, #tpu.memory_space<vmem>>, vector<2x128xf32>
    tpu.vector_store %arg9[%c0_20, %c0_21], %41 {strides = array<i32>} : memref<2x128xf32, #tpu.memory_space<vmem>>, vector<2x128xf32>,
    return
  }
  func.func @transform_0(%arg0: i32) -> (i32, i32) {
    %c0_i32 = arith.constant 0 : i32
    %c0_i32_0 = arith.constant 0 : i32
    return %c0_i32, %arg0 : i32, i32
  }
  func.func @transform_1(%arg0: i32) -> (i32, i32) {
    %c0_i32 = arith.constant 0 : i32
    %c0_i32_0 = arith.constant 0 : i32
    %c0_i32_1 = arith.constant 0 : i32
    return %c0_i32, %c0_i32_0 : i32, i32
  }
  func.func @transform_2(%arg0: i32) -> (i32, i32) {
    %c0_i32 = arith.constant 0 : i32
    %c0_i32_0 = arith.constant 0 : i32
    %c0_i32_1 = arith.constant 0 : i32
    return %c0_i32, %c0_i32_0 : i32, i32
  }
  func.func @transform_3(%arg0: i32) -> (i32, i32) {
    %c0_i32 = arith.constant 0 : i32
    %c0_i32_0 = arith.constant 0 : i32
    %c0_i32_1 = arith.constant 0 : i32
    return %c0_i32, %c0_i32_0 : i32, i32
  }
  func.func @transform_4(%arg0: i32) -> (i32, i32) {
    %c0_i32 = arith.constant 0 : i32
    %c0_i32_0 = arith.constant 0 : i32
    %c0_i32_1 = arith.constant 0 : i32
    return %c0_i32, %c0_i32_0 : i32, i32
  }
  func.func @transform_5(%arg0: i32) -> (i32, i32) {
    %c0_i32 = arith.constant 0 : i32
    %c0_i32_0 = arith.constant 0 : i32
    %c0_i32_1 = arith.constant 0 : i32
    return %c0_i32, %c0_i32_0 : i32, i32
  }
  func.func @transform_6(%arg0: i32) -> (i32, i32) {
    %c0_i32 = arith.constant 0 : i32
    %c0_i32_0 = arith.constant 0 : i32
    %c0_i32_1 = arith.constant 0 : i32
    return %c0_i32, %c0_i32_0 : i32, i32
  }
  func.func @transform_7(%arg0: i32) -> i32 {
    %c0_i32 = arith.constant 0 : i32
    %c0_i32_0 = arith.constant 0 : i32
    return %c0_i32 : i32
  }
  func.func @transform_8(%arg0: i32) -> (i32, i32) {
    %c0_i32 = arith.constant 0 : i32
    %c0_i32_0 = arith.constant 0 : i32
    return %c0_i32, %arg0 : i32, i32
  }
}

module attributes {stable_mosaic.version = 11 : i64} {
  func.func @_distillery_kernel(%arg0: i32, %arg1: memref<2x128xf32, #tpu.memory_space<vmem>>, %arg2: memref<128x2xf32, #tpu.memory_space<vmem>>, %arg3: memref<128x1xf32, #tpu.memory_space<vmem>>, %arg4: memref<128x128xbf16, #tpu.memory_space<vmem>>, %arg5: memref<128x1xf32, #tpu.memory_space<vmem>>, %arg6: memref<128x1xf32, #tpu.memory_space<vmem>>, %arg7: memref<2x1xf32, #tpu.memory_space<vmem>>, %arg8: memref<2xf32, #tpu.memory_space<smem>>, %arg9: memref<2x128xf32, #tpu.memory_space<vmem>>) attributes {dimension_semantics = [#tpu.dimension_semantics<parallel>], iteration_bounds = array<i64: 1>, scalar_prefetch = 0 : i64, scratch_operands = 0 : i64, tpu.core_type = #tpu.core_type<tc>, window_params = [{transform_indices = @transform_0, window_bounds = array<i64: 2, 128>}, {pipeline_mode = #tpu.pipeline_mode<synchronous>, transform_indices = @transform_1, window_bounds = array<i64: 128, 2>}, {pipeline_mode = #tpu.pipeline_mode<synchronous>, transform_indices = @transform_2, window_bounds = array<i64: 128, 1>}, {pipeline_mode = #tpu.pipeline_mode<synchronous>, transform_indices = @transform_3, window_bounds = array<i64: 128, 128>}, {pipeline_mode = #tpu.pipeline_mode<synchronous>, transform_indices = @transform_4, window_bounds = array<i64: 128, 1>}, {pipeline_mode = #tpu.pipeline_mode<synchronous>, transform_indices = @transform_5, window_bounds = array<i64: 128, 1>}, {pipeline_mode = #tpu.pipeline_mode<synchronous>, transform_indices = @transform_6, window_bounds = array<i64: 2, 1>}, {transform_indices = @transform_7, window_bounds = array<i64: 2>}, {transform_indices = @transform_8, window_bounds = array<i64: 2, 128>}]} {
    %c0 = arith.constant 0 : index
    %c0_0 = arith.constant 0 : index
    %0 = vector.load %arg1[%c0, %c0_0] : memref<2x128xf32, #tpu.memory_space<vmem>>, vector<2x128xf32>
    %c0_1 = arith.constant 0 : index
    %c0_2 = arith.constant 0 : index
    %1 = vector.load %arg3[%c0_1, %c0_2] : memref<128x1xf32, #tpu.memory_space<vmem>>, vector<128x1xf32>
    %c0_3 = arith.constant 0 : index
    %c0_4 = arith.constant 0 : index
    %2 = vector.load %arg2[%c0_3, %c0_4] : memref<128x2xf32, #tpu.memory_space<vmem>>, vector<128x1xf32>
    %3 = vector.extract_strided_slice %0 {offsets = [0, 0], sizes = [1, 128], strides = [1, 1]} : vector<2x128xf32> to vector<1x128xf32>
    %4 = vector.broadcast %2 : vector<128x1xf32> to vector<128x128xf32>
    %5 = vector.broadcast %3 : vector<1x128xf32> to vector<128x128xf32>
    %6 = arith.mulf %4, %5 : vector<128x128xf32>
    %7 = vector.broadcast %1 : vector<128x1xf32> to vector<128x128xf32>
    %8 = arith.addf %7, %6 : vector<128x128xf32>
    %c0_5 = arith.constant 0 : index
    %c1 = arith.constant 1 : index
    %9 = vector.load %arg2[%c0_5, %c1] : memref<128x2xf32, #tpu.memory_space<vmem>>, vector<128x1xf32>
    %10 = vector.extract_strided_slice %0 {offsets = [1, 0], sizes = [1, 128], strides = [1, 1]} : vector<2x128xf32> to vector<1x128xf32>
    %11 = vector.broadcast %9 : vector<128x1xf32> to vector<128x128xf32>
    %12 = vector.broadcast %10 : vector<1x128xf32> to vector<128x128xf32>
    %13 = arith.mulf %11, %12 : vector<128x128xf32>
    %14 = arith.addf %8, %13 : vector<128x128xf32>
    %cst = arith.constant 0.000000e+00 : f32
    %15 = vector.broadcast %cst : f32 to vector<128x128xf32>
    %16 = arith.maximumf %14, %15 : vector<128x128xf32>
    %c0_6 = arith.constant 0 : index
    %c0_7 = arith.constant 0 : index
    %17 = vector.load %arg4[%c0_6, %c0_7] : memref<128x128xbf16, #tpu.memory_space<vmem>>, vector<128x128xbf16>
    %18 = arith.truncf %16 : vector<128x128xf32> to vector<128x128xbf16>
    %cst_8 = arith.constant dense<0.000000e+00> : vector<128x128xf32>
    %19 = tpu.matmul %17, %18, %cst_8 {dimension_numbers = #tpu.dot_dimension_numbers<[1], [0], [0], [1], [0, 0, 1, 1], [], []>} : vector<128x128xbf16>, vector<128x128xbf16>, vector<128x128xf32> -> vector<128x128xf32>
    %c0_9 = arith.constant 0 : index
    %c0_10 = arith.constant 0 : index
    %20 = vector.load %arg5[%c0_9, %c0_10] : memref<128x1xf32, #tpu.memory_space<vmem>>, vector<128x1xf32>
    %21 = vector.broadcast %20 : vector<128x1xf32> to vector<128x128xf32>
    %22 = arith.addf %19, %21 : vector<128x128xf32>
    %cst_11 = arith.constant 0.000000e+00 : f32
    %23 = vector.broadcast %cst_11 : f32 to vector<128x128xf32>
    %24 = arith.maximumf %22, %23 : vector<128x128xf32>
    %c0_12 = arith.constant 0 : index
    %c0_13 = arith.constant 0 : index
    %25 = vector.load %arg6[%c0_12, %c0_13] : memref<128x1xf32, #tpu.memory_space<vmem>>, vector<128x1xf32>
    %26 = vector.broadcast %25 : vector<128x1xf32> to vector<128x128xf32>
    %27 = arith.mulf %24, %26 : vector<128x128xf32>
    %cst_14 = arith.constant dense<0.000000e+00> : vector<128xf32>
    %28 = vector.multi_reduction <add>, %27, %cst_14 [0] : vector<128x128xf32> to vector<128xf32>
    %29 = vector.shape_cast %28 : vector<128xf32> to vector<1x128xf32>
    %c0_15 = arith.constant 0 : index
    %30 = memref.load %arg8[%c0_15] : memref<2xf32, #tpu.memory_space<smem>>
    %31 = vector.broadcast %30 : f32 to vector<1x128xf32>
    %32 = arith.addf %29, %31 : vector<1x128xf32>
    %c0_16 = arith.constant 0 : index
    %c0_17 = arith.constant 0 : index
    %33 = vector.load %arg7[%c0_16, %c0_17] : memref<2x1xf32, #tpu.memory_space<vmem>>, vector<2x1xf32>
    %34 = vector.broadcast %33 : vector<2x1xf32> to vector<2x128xf32>
    %35 = arith.mulf %0, %34 : vector<2x128xf32>
    %cst_18 = arith.constant dense<0.000000e+00> : vector<128xf32>
    %36 = vector.multi_reduction <add>, %35, %cst_18 [0] : vector<2x128xf32> to vector<128xf32>
    %37 = vector.shape_cast %36 : vector<128xf32> to vector<1x128xf32>
    %c1_19 = arith.constant 1 : index
    %38 = memref.load %arg8[%c1_19] : memref<2xf32, #tpu.memory_space<smem>>
    %39 = vector.broadcast %38 : f32 to vector<1x128xf32>
    %40 = arith.addf %37, %39 : vector<1x128xf32>
    %41 = tpu.concatenate %32, %40 in 0 : vector<1x128xf32>, vector<1x128xf32> -> vector<2x128xf32>
    %c0_20 = arith.constant 0 : index
    %c0_21 = arith.constant 0 : index
    %42 = vector.load %arg9[%c0_20, %c0_21] : memref<2x128xf32, #tpu.memory_space<vmem>>, vector<2x128xf32>
    tpu.vector_store %arg9[%c0_20, %c0_21], %41 {strides = array<i32>} : memref<2x128xf32, #tpu.memory_space<vmem>>, vector<2x128xf32>,
    return
  }
  func.func @transform_0(%arg0: i32) -> (i32, i32) {
    %c0_i32 = arith.constant 0 : i32
    %c0_i32_0 = arith.constant 0 : i32
    return %c0_i32, %arg0 : i32, i32
  }
  func.func @transform_1(%arg0: i32) -> (i32, i32) {
    %c0_i32 = arith.constant 0 : i32
    %c0_i32_0 = arith.constant 0 : i32
    %c0_i32_1 = arith.constant 0 : i32
    return %c0_i32, %c0_i32_0 : i32, i32
  }
  func.func @transform_2(%arg0: i32) -> (i32, i32) {
    %c0_i32 = arith.constant 0 : i32
    %c0_i32_0 = arith.constant 0 : i32
    %c0_i32_1 = arith.constant 0 : i32
    return %c0_i32, %c0_i32_0 : i32, i32
  }
  func.func @transform_3(%arg0: i32) -> (i32, i32) {
    %c0_i32 = arith.constant 0 : i32
    %c0_i32_0 = arith.constant 0 : i32
    %c0_i32_1 = arith.constant 0 : i32
    return %c0_i32, %c0_i32_0 : i32, i32
  }
  func.func @transform_4(%arg0: i32) -> (i32, i32) {
    %c0_i32 = arith.constant 0 : i32
    %c0_i32_0 = arith.constant 0 : i32
    %c0_i32_1 = arith.constant 0 : i32
    return %c0_i32, %c0_i32_0 : i32, i32
  }
  func.func @transform_5(%arg0: i32) -> (i32, i32) {
    %c0_i32 = arith.constant 0 : i32
    %c0_i32_0 = arith.constant 0 : i32
    %c0_i32_1 = arith.constant 0 : i32
    return %c0_i32, %c0_i32_0 : i32, i32
  }
  func.func @transform_6(%arg0: i32) -> (i32, i32) {
    %c0_i32 = arith.constant 0 : i32
    %c0_i32_0 = arith.constant 0 : i32
    %c0_i32_1 = arith.constant 0 : i32
    return %c0_i32, %c0_i32_0 : i32, i32
  }
  func.func @transform_7(%arg0: i32) -> i32 {
    %c0_i32 = arith.constant 0 : i32
    %c0_i32_0 = arith.constant 0 : i32
    return %c0_i32 : i32
  }
  func.func @transform_8(%arg0: i32) -> (i32, i32) {
    %c0_i32 = arith.constant 0 : i32
    %c0_i32_0 = arith.constant 0 : i32
    return %c0_i32, %arg0 : i32, i32
  }
}

module attributes {stable_mosaic.version = 11 : i64} {
  func.func @_distillery_kernel(%arg0: i32, %arg1: memref<2x128xf32, #tpu.memory_space<vmem>>, %arg2: memref<128x2xf32, #tpu.memory_space<vmem>>, %arg3: memref<128x1xf32, #tpu.memory_space<vmem>>, %arg4: memref<128x128xbf16, #tpu.memory_space<vmem>>, %arg5: memref<128x1xf32, #tpu.memory_space<vmem>>, %arg6: memref<128x1xf32, #tpu.memory_space<vmem>>, %arg7: memref<2x1xf32, #tpu.memory_space<vmem>>, %arg8: memref<2xf32, #tpu.memory_space<smem>>, %arg9: memref<2x128xf32, #tpu.memory_space<vmem>>) attributes {dimension_semantics = [#tpu.dimension_semantics<arbitrary>], iteration_bounds = array<i64: 1>, scalar_prefetch = 0 : i64, scratch_operands = 0 : i64, tpu.core_type = #tpu.core_type<tc>, window_params = [{transform_indices = @transform_0, window_bounds = array<i64: 2, 128>}, {pipeline_mode = #tpu.pipeline_mode<synchronous>, transform_indices = @transform_1, window_bounds = array<i64: 128, 2>}, {pipeline_mode = #tpu.pipeline_mode<synchronous>, transform_indices = @transform_2, window_bounds = array<i64: 128, 1>}, {pipeline_mode = #tpu.pipeline_mode<synchronous>, transform_indices = @transform_3, window_bounds = array<i64: 128, 128>}, {pipeline_mode = #tpu.pipeline_mode<synchronous>, transform_indices = @transform_4, window_bounds = array<i64: 128, 1>}, {pipeline_mode = #tpu.pipeline_mode<synchronous>, transform_indices = @transform_5, window_bounds = array<i64: 128, 1>}, {pipeline_mode = #tpu.pipeline_mode<synchronous>, transform_indices = @transform_6, window_bounds = array<i64: 2, 1>}, {transform_indices = @transform_7, window_bounds = array<i64: 2>}, {transform_indices = @transform_8, window_bounds = array<i64: 2, 128>}]} {
    %c0 = arith.constant 0 : index
    %c0_0 = arith.constant 0 : index
    %0 = vector.load %arg1[%c0, %c0_0] : memref<2x128xf32, #tpu.memory_space<vmem>>, vector<2x128xf32>
    %c0_1 = arith.constant 0 : index
    %c0_2 = arith.constant 0 : index
    %1 = vector.load %arg3[%c0_1, %c0_2] : memref<128x1xf32, #tpu.memory_space<vmem>>, vector<128x1xf32>
    %c0_3 = arith.constant 0 : index
    %c0_4 = arith.constant 0 : index
    %2 = vector.load %arg2[%c0_3, %c0_4] : memref<128x2xf32, #tpu.memory_space<vmem>>, vector<128x1xf32>
    %3 = vector.extract_strided_slice %0 {offsets = [0, 0], sizes = [1, 128], strides = [1, 1]} : vector<2x128xf32> to vector<1x128xf32>
    %4 = vector.broadcast %2 : vector<128x1xf32> to vector<128x128xf32>
    %5 = vector.broadcast %3 : vector<1x128xf32> to vector<128x128xf32>
    %6 = arith.mulf %4, %5 : vector<128x128xf32>
    %7 = vector.broadcast %1 : vector<128x1xf32> to vector<128x128xf32>
    %8 = arith.addf %7, %6 : vector<128x128xf32>
    %c0_5 = arith.constant 0 : index
    %c1 = arith.constant 1 : index
    %9 = vector.load %arg2[%c0_5, %c1] : memref<128x2xf32, #tpu.memory_space<vmem>>, vector<128x1xf32>
    %10 = vector.extract_strided_slice %0 {offsets = [1, 0], sizes = [1, 128], strides = [1, 1]} : vector<2x128xf32> to vector<1x128xf32>
    %11 = vector.broadcast %9 : vector<128x1xf32> to vector<128x128xf32>
    %12 = vector.broadcast %10 : vector<1x128xf32> to vector<128x128xf32>
    %13 = arith.mulf %11, %12 : vector<128x128xf32>
    %14 = arith.addf %8, %13 : vector<128x128xf32>
    %cst = arith.constant 0.000000e+00 : f32
    %15 = vector.broadcast %cst : f32 to vector<128x128xf32>
    %16 = arith.maximumf %14, %15 : vector<128x128xf32>
    %c0_6 = arith.constant 0 : index
    %c0_7 = arith.constant 0 : index
    %17 = vector.load %arg4[%c0_6, %c0_7] : memref<128x128xbf16, #tpu.memory_space<vmem>>, vector<128x128xbf16>
    %18 = arith.truncf %16 : vector<128x128xf32> to vector<128x128xbf16>
    %cst_8 = arith.constant dense<0.000000e+00> : vector<128x128xf32>
    %19 = tpu.matmul %17, %18, %cst_8 {dimension_numbers = #tpu.dot_dimension_numbers<[1], [0], [0], [1], [0, 0, 1, 1], [], []>} : vector<128x128xbf16>, vector<128x128xbf16>, vector<128x128xf32> -> vector<128x128xf32>
    %c0_9 = arith.constant 0 : index
    %c0_10 = arith.constant 0 : index
    %20 = vector.load %arg5[%c0_9, %c0_10] : memref<128x1xf32, #tpu.memory_space<vmem>>, vector<128x1xf32>
    %21 = vector.broadcast %20 : vector<128x1xf32> to vector<128x128xf32>
    %22 = arith.addf %19, %21 : vector<128x128xf32>
    %cst_11 = arith.constant 0.000000e+00 : f32
    %23 = vector.broadcast %cst_11 : f32 to vector<128x128xf32>
    %24 = arith.maximumf %22, %23 : vector<128x128xf32>
    %c0_12 = arith.constant 0 : index
    %c0_13 = arith.constant 0 : index
    %25 = vector.load %arg6[%c0_12, %c0_13] : memref<128x1xf32, #tpu.memory_space<vmem>>, vector<128x1xf32>
    %26 = vector.broadcast %25 : vector<128x1xf32> to vector<128x128xf32>
    %27 = arith.mulf %24, %26 : vector<128x128xf32>
    %cst_14 = arith.constant dense<0.000000e+00> : vector<128xf32>
    %28 = vector.multi_reduction <add>, %27, %cst_14 [0] : vector<128x128xf32> to vector<128xf32>
    %29 = vector.shape_cast %28 : vector<128xf32> to vector<1x128xf32>
    %c0_15 = arith.constant 0 : index
    %30 = memref.load %arg8[%c0_15] : memref<2xf32, #tpu.memory_space<smem>>
    %31 = vector.broadcast %30 : f32 to vector<1x128xf32>
    %32 = arith.addf %29, %31 : vector<1x128xf32>
    %c0_16 = arith.constant 0 : index
    %c0_17 = arith.constant 0 : index
    %33 = vector.load %arg7[%c0_16, %c0_17] : memref<2x1xf32, #tpu.memory_space<vmem>>, vector<2x1xf32>
    %34 = vector.broadcast %33 : vector<2x1xf32> to vector<2x128xf32>
    %35 = arith.mulf %0, %34 : vector<2x128xf32>
    %cst_18 = arith.constant dense<0.000000e+00> : vector<128xf32>
    %36 = vector.multi_reduction <add>, %35, %cst_18 [0] : vector<2x128xf32> to vector<128xf32>
    %37 = vector.shape_cast %36 : vector<128xf32> to vector<1x128xf32>
    %c1_19 = arith.constant 1 : index
    %38 = memref.load %arg8[%c1_19] : memref<2xf32, #tpu.memory_space<smem>>
    %39 = vector.broadcast %38 : f32 to vector<1x128xf32>
    %40 = arith.addf %37, %39 : vector<1x128xf32>
    %41 = tpu.concatenate %32, %40 in 0 : vector<1x128xf32>, vector<1x128xf32> -> vector<2x128xf32>
    %c0_20 = arith.constant 0 : index
    %c0_21 = arith.constant 0 : index
    %42 = vector.load %arg9[%c0_20, %c0_21] : memref<2x128xf32, #tpu.memory_space<vmem>>, vector<2x128xf32>
    tpu.vector_store %arg9[%c0_20, %c0_21], %41 {strides = array<i32>} : memref<2x128xf32, #tpu.memory_space<vmem>>, vector<2x128xf32>,
    return
  }
  func.func @transform_0(%arg0: i32) -> (i32, i32) {
    %c0_i32 = arith.constant 0 : i32
    %c0_i32_0 = arith.constant 0 : i32
    return %c0_i32, %arg0 : i32, i32
  }
  func.func @transform_1(%arg0: i32) -> (i32, i32) {
    %c0_i32 = arith.constant 0 : i32
    %c0_i32_0 = arith.constant 0 : i32
    %c0_i32_1 = arith.constant 0 : i32
    return %c0_i32, %c0_i32_0 : i32, i32
  }
  func.func @transform_2(%arg0: i32) -> (i32, i32) {
    %c0_i32 = arith.constant 0 : i32
    %c0_i32_0 = arith.constant 0 : i32
    %c0_i32_1 = arith.constant 0 : i32
    return %c0_i32, %c0_i32_0 : i32, i32
  }
  func.func @transform_3(%arg0: i32) -> (i32, i32) {
    %c0_i32 = arith.constant 0 : i32
    %c0_i32_0 = arith.constant 0 : i32
    %c0_i32_1 = arith.constant 0 : i32
    return %c0_i32, %c0_i32_0 : i32, i32
  }
  func.func @transform_4(%arg0: i32) -> (i32, i32) {
    %c0_i32 = arith.constant 0 : i32
    %c0_i32_0 = arith.constant 0 : i32
    %c0_i32_1 = arith.constant 0 : i32
    return %c0_i32, %c0_i32_0 : i32, i32
  }
  func.func @transform_5(%arg0: i32) -> (i32, i32) {
    %c0_i32 = arith.constant 0 : i32
    %c0_i32_0 = arith.constant 0 : i32
    %c0_i32_1 = arith.constant 0 : i32
    return %c0_i32, %c0_i32_0 : i32, i32
  }
  func.func @transform_6(%arg0: i32) -> (i32, i32) {
    %c0_i32 = arith.constant 0 : i32
    %c0_i32_0 = arith.constant 0 : i32
    %c0_i32_1 = arith.constant 0 : i32
    return %c0_i32, %c0_i32_0 : i32, i32
  }
  func.func @transform_7(%arg0: i32) -> i32 {
    %c0_i32 = arith.constant 0 : i32
    %c0_i32_0 = arith.constant 0 : i32
    return %c0_i32 : i32
  }
  func.func @transform_8(%arg0: i32) -> (i32, i32) {
    %c0_i32 = arith.constant 0 : i32
    %c0_i32_0 = arith.constant 0 : i32
    return %c0_i32, %arg0 : i32, i32
  }
}

</mosaic_0001>

<bundles_post_ra>
// kernel: tpu_custom_call.1
= control target key start
LH: loop header
LB: loop body
LE: loop exit
PB: predicated region body
PF: predicated region fallthrough
CT: control target
= control target key end

     0   :  { %13 = vsyncpa [#allocation4], 0  ;;  %s1381_s0 = inlined_call_operand.vmem [shape: f32[2,128], index: 0, kind: input, shape index: {}]   ;;  %s1382_s1 = inlined_call_operand.vmem [shape: f32[128,2], index: 1, kind: input, shape index: {}]   ;;  %s1383_s2 = inlined_call_operand.vmem [shape: f32[128,1], index: 2, kind: input, shape index: {}]   ;;  %s1384_s3 = inlined_call_operand.vmem [shape: bf16[128,128], index: 3, kind: input, shape index: {}]   ;;  %s1385_s4 = inlined_call_operand.vmem [shape: f32[128,1], index: 4, kind: input, shape index: {}]   ;;  %s1386_s5 = inlined_call_operand.vmem [shape: f32[128,1], index: 5, kind: input, shape index: {}]   ;;  %s1387_s6 = inlined_call_operand.vmem [shape: f32[2,1], index: 6, kind: input, shape index: {}]   ;;  %s1388_s7 = inlined_call_operand.vmem [shape: f32[2], index: 7, kind: input, shape index: {}]   ;;  %s1389_s8 = inlined_call_operand.hbm [shape: f32[2,128], index: 8, kind: output, shape index: {}]  }
   0x1   :  { %14 = vsyncpa [#allocation3], 0  ;;  %s35_s29 = sshll.u32 %s1388_s7, 4  ;;  %s36_s29 = int_to_ptr.vmem [resolvable:$true] %s35_s29 }
   0x2   :  { %s947_s30 = scalar_lea.vmem %s36_s29, 16  ;;  %p952_p1 = scmp.lt.s32.totalorder %s36_s29, %s36_s29 }
   0x3   :  { %p948_p0 = scmp.ne.s32.totalorder %s36_s29, %s947_s30  ;;  %p953_p2 = scmp.lt.s32.totalorder %s947_s30, %s947_s30 }
   0x5   :  { %p954_p3 = por %p953_p2, %p952_p1 }
   0x7   :  { %p955_p4 = pnand %p954_p3, %p948_p0 }
   0x9   :  { %958 = shalt.err (!%p955_p4)
}
   0xa   :  { %s985_s9 = smov [#allocation2]  }
   0xb   :  { %38 = dma.vmem_to_smem %s36_s29, 16, %s985_s9, [#allocation4]  }
   0xc   :  { %981 = dma.done.wait [#allocation4], 16  }
   0xd   :  { %982 = vsyncadd [#allocation4], 4294967280 }
   0xe   :  { %42 = sfence }
   0xf   :  { %v61_v0 = vld [vmem:[%s1382_s1] sm:$0xff]  ;;  %v986_v2 = vmov 0   ;;  %v62_v3 = vld [vmem:[%s1382_s1 + $0x8] sm:$0xff]  ;;  %v64_v5 = vld [vmem:[%s1382_s1 + $0x18] sm:$0xff]  ;;  %v987_v6 = vmov 1   ;;  %v157_v49 = vlaneseq  ;;  %vm813_vm0 = vcmask 1041408  }
  0x10   :  { %v45_v1 = vld [vmem:[%s1383_s2] sm:$0xff]  ;;  %920 = vset.pattern.permute.xlu1 %v986_v2  ;;  %919 = vset.pattern.permute.xlu0 %v986_v2  ;;  %v46_v4 = vld [vmem:[%s1383_s2 + $0x8] sm:$0xff]  ;;  %v63_v8 = vld [vmem:[%s1382_s1 + $0x10] sm:$0xff]  ;;  %s988_s29 = smov [#allocation5]   ;;  %vm824_vm1 = vcmask 1040384  }
  0x11   :  { %79 = vperm.xlu0 %919, %v61_v0   ;;  %179 = vperm.xlu1 %920, %v45_v1   ;;  %v66_v7 = vld [vmem:[%s1382_s1 + $0x28] sm:$0xff]  ;;  %v68_v9 = vld [vmem:[%s1382_s1 + $0x38] sm:$0xff]  ;;  %v47_v10 = vld [vmem:[%s1383_s2 + $0x10] sm:$0xff]  ;;  %v158_v54 = vshrl.u32 %v157_v49, 7  ;;  %s833_s30 = sshll.u32 %s988_s29, 4  ;;  %s834_s30 = int_to_ptr.vmem [resolvable:$true] %s833_s30 }
  0x12   :  { %v70_v11 = vld [vmem:[%s1382_s1 + $0x48] sm:$0xff]  ;;  %v48_v12 = vld [vmem:[%s1383_s2 + $0x18] sm:$0xff]  ;;  %v65_v16 = vld [vmem:[%s1382_s1 + $0x20] sm:$0xff]  ;;  %s959_s9 = scalar_lea.vmem %s834_s30, 32  ;;  %p964_p6 = scmp.lt.s32.totalorder %s834_s30, %s834_s30 }
  0x13   :  { %v72_v13 = vld [vmem:[%s1382_s1 + $0x58] sm:$0xff]  ;;  %v74_v14 = vld [vmem:[%s1382_s1 + $0x68] sm:$0xff]  ;;  %v49_v17 = vld [vmem:[%s1383_s2 + $0x20] sm:$0xff]  ;;  %v159_v59 = vsub.s32 0, %v158_v54  ;;  %v339_v60 = vsub.s32 1, %v158_v54  ;;  %p960_p5 = scmp.ne.s32.totalorder %s834_s30, %s959_s9  ;;  %p965_p7 = scmp.lt.s32.totalorder %s959_s9, %s959_s9 }
  0x14   :  { %v1084_v15 = vld [vmem:[%s1382_s1 + $0x78] sm:$0xff]  ;;  %v50_v18 = vld [vmem:[%s1383_s2 + $0x28] sm:$0xff]  ;;  %v67_v19 = vld [vmem:[%s1382_s1 + $0x30] sm:$0xff] }
  0x15   :  { %84 = vperm.xlu0 %919, %v62_v3   ;;  %184 = vperm.xlu1 %920, %v46_v4   ;;  %v51_v20 = vld [vmem:[%s1383_s2 + $0x30] sm:$0xff]  ;;  %v69_v21 = vld [vmem:[%s1382_s1 + $0x40] sm:$0xff]  ;;  %v52_v22 = vld [vmem:[%s1383_s2 + $0x38] sm:$0xff]  ;;  %p966_p8 = por %p965_p7, %p964_p6 }
  0x16   :  { %v71_v23 = vld [vmem:[%s1382_s1 + $0x50] sm:$0xff]  ;;  %v73_v24 = vld [vmem:[%s1382_s1 + $0x60] sm:$0xff]  ;;  %v54_v27 = vld [vmem:[%s1383_s2 + $0x48] sm:$0xff] }
  0x17   :  { %v75_v25 = vld [vmem:[%s1382_s1 + $0x70] sm:$0xff]  ;;  %v53_v26 = vld [vmem:[%s1383_s2 + $0x40] sm:$0xff]  ;;  %v56_v29 = vld [vmem:[%s1383_s2 + $0x58] sm:$0xff]  ;;  %p967_p9 = pnand %p966_p8, %p960_p5 }
  0x18   :  { %v55_v28 = vld [vmem:[%s1383_s2 + $0x50] sm:$0xff]  ;;  %v57_v30 = vld [vmem:[%s1383_s2 + $0x60] sm:$0xff]  ;;  %v58_v31 = vld [vmem:[%s1383_s2 + $0x68] sm:$0xff] }
  0x19   :  { %94 = vperm.xlu0 %919, %v64_v5   ;;  %921 = vset.pattern.permute.xlu1 %v987_v6  ;;  %v59_v32 = vld [vmem:[%s1383_s2 + $0x70] sm:$0xff]  ;;  %v60_v35 = vld [vmem:[%s1383_s2 + $0x78] sm:$0xff]  ;;  %v413_v40 = vld [vmem:[%s1385_s4] sm:$0xff]  ;;  %s850_s2 = sld [smem:[#allocation2 + $0x1]] }
  0x1a   :  { %278 = vperm.xlu1 %921, %v62_v3   ;;  %v414_v42 = vld [vmem:[%s1385_s4 + $0x8] sm:$0xff]  ;;  %v415_v44 = vld [vmem:[%s1385_s4 + $0x10] sm:$0xff]  ;;  %v417_v46 = vld [vmem:[%s1385_s4 + $0x20] sm:$0xff] }
  0x1b   :  { %v939_v47 = vld [vmem:[%s1384_s3] sm:$0xff]   ;;  %v416_v51 = vld [vmem:[%s1385_s4 + $0x18] sm:$0xff]  ;;  %v671_v53 = vld [vmem:[%s1386_s5 + $0x8] sm:$0xff] }
  0x1c   :  { %v940_v48 = vld [vmem:[%s1384_s3 + $0x20] sm:$0xff]   ;;  %883 = vmatprep.mubr.bf16.mxu0 %v939_v47  ;;  %v418_v57 = vld [vmem:[%s1385_s4 + $0x28] sm:$0xff]  ;;  %v672_v61 = vld [vmem:[%s1386_s5 + $0x10] sm:$0xff] }
  0x1d   :  { %104 = vperm.xlu0 %919, %v66_v7   ;;  %891 = vmatprep.mubr.bf16.mxu1 %v940_v48  ;;  %v670_v56 = vld [vmem:[%s1386_s5] sm:$0xff]  ;;  %v419_v1 = vld [vmem:[%s1385_s4 + $0x30] sm:$0xff]  ;;  %v673_v4 = vld [vmem:[%s1386_s5 + $0x18] sm:$0xff] }
  0x1e   :  { %922 = vset.pattern.permute.xlu1 %v986_v2  ;;  %v1203_v62 = vld [vmem:[%s1381_s0] sm:$0x3]  ;;  %v677_v48 = vld [vmem:[%s1386_s5 + $0x38] sm:$0xff] }
  0x1f   :  { %89 = vperm.xlu1 %922, %v63_v8   ;;  %v1214_v3 = vrot.slane %v1203_v62, %v339_v60  ;;  %v425_v60 = vld [vmem:[%s1385_s4 + $0x60] sm:$0xff] }
  0x21   :  { %114 = vperm.xlu0 %919, %v68_v9  }
  0x23   :  { %189 = vperm.xlu1 %922, %v47_v10  }
  0x25   :  { %124 = vperm.xlu0 %919, %v70_v11  }
  0x27   :  { %194 = vperm.xlu1 %922, %v48_v12  }
  0x29   :  { %134 = vperm.xlu0 %919, %v72_v13  }
  0x2b   :  { %923 = vset.pattern.permute.xlu1 %v987_v6 }
  0x2c   :  { %286 = vperm.xlu1 %923, %v64_v5   ;;  %v420_v5 = vld [vmem:[%s1385_s4 + $0x38] sm:$0xff] }
  0x2d   :  { %144 = vperm.xlu0 %919, %v74_v14  }
  0x30   :  { %924 = vset.pattern.permute.xlu1 %v986_v2 }
  0x31   :  { %154 = vperm.xlu0 %919, %v1084_v15   ;;  %99 = vperm.xlu1 %924, %v65_v16  }
  0x35   :  { %935 = vset.pattern.permute.xlu0 %v987_v6  ;;  %199 = vperm.xlu1 %924, %v49_v17  }
  0x36   :  { %274 = vperm.xlu0 %935, %v61_v0  }
  0x39   :  { %204 = vperm.xlu1 %924, %v50_v18  }
  0x3a   :  { %282 = vperm.xlu0 %935, %v63_v8  }
  0x3d   :  { %925 = vset.pattern.permute.xlu1 %v987_v6 }
  0x3e   :  { %290 = vperm.xlu0 %935, %v65_v16   ;;  %294 = vperm.xlu1 %925, %v66_v7  }
  0x42   :  { %926 = vset.pattern.permute.xlu1 %v986_v2  ;;  %298 = vperm.xlu0 %935, %v67_v19  }
  0x43   :  { %109 = vperm.xlu1 %926, %v67_v19  }
  0x46   :  { %306 = vperm.xlu0 %935, %v69_v21  }
  0x47   :  { %209 = vperm.xlu1 %926, %v51_v20  }
  0x4a   :  { %314 = vperm.xlu0 %935, %v71_v23  }
  0x4b   :  { %214 = vperm.xlu1 %926, %v52_v22  }
  0x4e   :  { %322 = vperm.xlu0 %935, %v73_v24  }
  0x4f   :  { %927 = vset.pattern.permute.xlu1 %v987_v6 }
  0x50   :  { %302 = vperm.xlu1 %927, %v68_v9  }
  0x52   :  { %330 = vperm.xlu0 %935, %v75_v25  }
  0x54   :  { %928 = vset.pattern.permute.xlu1 %v986_v2 }
  0x55   :  { %119 = vperm.xlu1 %928, %v69_v21   ;;  %v675_v21 = vld [vmem:[%s1386_s5 + $0x28] sm:$0xff] }
  0x56   :  { %938 = vset.pattern.permute.xlu0 %v986_v2 }
  0x57   :  { %436 = vperm.xlu0 %938, %v414_v42   ;;  %v423_v42 = vld [vmem:[%s1385_s4 + $0x50] sm:$0xff] }
  0x59   :  { %219 = vperm.xlu1 %928, %v53_v26  }
  0x5b   :  { %451 = vperm.xlu0 %938, %v417_v46  }
  0x5d   :  { %224 = vperm.xlu1 %928, %v54_v27  }
  0x5f   :  { %693 = vperm.xlu0 %938, %v671_v53   ;;  %v424_v53 = vld [vmem:[%s1385_s4 + $0x58] sm:$0xff] }
  0x61   :  { %929 = vset.pattern.permute.xlu1 %v987_v6 }
  0x62   :  { %310 = vperm.xlu1 %929, %v70_v11   ;;  %v674_v11 = vld [vmem:[%s1386_s5 + $0x20] sm:$0xff] }
  0x63   :  { %456 = vperm.xlu0 %938, %v418_v57   ;;  %v678_v57 = vld [vmem:[%s1386_s5 + $0x40] sm:$0xff] }
  0x66   :  { %930 = vset.pattern.permute.xlu1 %v986_v2 }
  0x67   :  { %129 = vperm.xlu1 %930, %v71_v23   ;;  %461 = vperm.xlu0 %938, %v419_v1   ;;  %v422_v23 = vld [vmem:[%s1385_s4 + $0x48] sm:$0xff] }
  0x6b   :  { %229 = vperm.xlu1 %930, %v55_v28   ;;  %466 = vperm.xlu0 %938, %v420_v5  }
  0x6f   :  { %234 = vperm.xlu1 %930, %v56_v29  }
  0x73   :  { %931 = vset.pattern.permute.xlu1 %v987_v6 }
  0x74   :  { %318 = vperm.xlu1 %931, %v72_v13   ;;  %v421_v13 = vld [vmem:[%s1385_s4 + $0x40] sm:$0xff] }
  0x75   :  { %471 = vperm.xlu0 %938, %v421_v13   ;;  %v681_v13 = vld [vmem:[%s1386_s5 + $0x58] sm:$0xff] }
  0x78   :  { %932 = vset.pattern.permute.xlu1 %v986_v2 }
  0x79   :  { %139 = vperm.xlu1 %932, %v73_v24   ;;  %476 = vperm.xlu0 %938, %v422_v23  }
  0x7d   :  { %239 = vperm.xlu1 %932, %v57_v30   ;;  %481 = vperm.xlu0 %938, %v423_v42  }
  0x81   :  { %244 = vperm.xlu1 %932, %v58_v31   ;;  %486 = vperm.xlu0 %938, %v424_v53  }
  0x85   :  { %933 = vset.pattern.permute.xlu1 %v987_v6  ;;  %491 = vperm.xlu0 %938, %v425_v60  }
  0x86   :  { %326 = vperm.xlu1 %933, %v74_v14  }
  0x8a   :  { %934 = vset.pattern.permute.xlu1 %v986_v2 }
  0x8b   :  { %149 = vperm.xlu1 %934, %v75_v25  }
  0x8f   :  { %249 = vperm.xlu1 %934, %v59_v32  }
  0x90   :  { %v80_v33 = vpop.permute.xlu0 %79  ;;  %v1151_v34 = vpop.permute.xlu1 %179 }
  0x93   :  { %254 = vperm.xlu1 %934, %v60_v35  }
  0x94   :  { %v85_v36 = vpop.permute.xlu0 %84  ;;  %v185_v37 = vpop.permute.xlu1 %184 }
  0x97   :  { %936 = vset.pattern.permute.xlu1 %v987_v6 }
  0x98   :  { %334 = vperm.xlu1 %936, %v1084_v15   ;;  %v95_v38 = vpop.permute.xlu0 %94 }
  0x99   :  { %v279_v39 = vpop.permute.xlu1 %278 }
  0x9a   :  { %v342_v10 = vmul.f32 %v1214_v3, %v279_v39 }
  0x9c   :  { %v1161_v41 = vpop.permute.xlu0 %104  ;;  %937 = vset.pattern.permute.xlu1 %v986_v2  ;;  %v1211_v2 = vrot.slane %v1203_v62, %v159_v59 }
  0x9d   :  { %431 = vperm.xlu1 %937, %v413_v40  }
  0x9e   :  { %v90_v43 = vpop.permute.xlu1 %89  ;;  %v162_v6 = vmul.f32 %v1211_v2, %v85_v36  ;;  %v161_v9 = vmul.f32 %v1211_v2, %v80_v33  ;;  %v164_v12 = vmul.f32 %v1211_v2, %v95_v38  ;;  %v166_v27 = vmul.f32 %v1211_v2, %v1161_v41 }
  0x9f   :  { %v163_v24 = vmul.f32 %v1211_v2, %v90_v43 }
  0xa0   :  { %v1170_v45 = vpop.permute.xlu0 %114  ;;  %v258_v14 = vadd.f32 %v185_v37, %v162_v6  ;;  %v257_v18 = vadd.f32 %v1151_v34, %v161_v9  ;;  %v676_v34 = vld [vmem:[%s1386_s5 + $0x30] sm:$0xff] }
  0xa1   :  { %441 = vperm.xlu1 %937, %v415_v44   ;;  %v168_v9 = vmul.f32 %v1211_v2, %v1170_v45  ;;  %v428_v45 = vld [vmem:[%s1385_s4 + $0x78] sm:$0xff] }
  0xa2   :  { %v190_v50 = vpop.permute.xlu1 %189  ;;  %v358_v19 = vadd.f32 %v342_v10, %v258_v14 }
  0xa3   :  { %v259_v31 = vadd.f32 %v190_v50, %v163_v24  ;;  %v684_v24 = vld [vmem:[%s1386_s5 + $0x70] sm:$0xff] }
  0xa4   :  { %v1184_v52 = vpop.permute.xlu0 %124  ;;  %v374_v30 = vmax.f32 %v358_v19, 0.0  ;;  %v682_v19 = vld [vmem:[%s1386_s5 + $0x60] sm:$0xff] }
  0xa5   :  { %446 = vperm.xlu1 %937, %v416_v51  }
  0xa6   :  { %v195_v55 = vpop.permute.xlu1 %194 }
  0xa7   :  { %v260_v22 = vadd.f32 %v195_v55, %v164_v12  ;;  %v427_v12 = vld [vmem:[%s1385_s4 + $0x70] sm:$0xff] }
  0xa8   :  { %v1195_v58 = vpop.permute.xlu0 %134 }
  0xa9   :  { %688 = vperm.xlu1 %937, %v670_v56  }
  0xab   :  { %v287_v63 = vpop.permute.xlu1 %286 }
  0xac   :  { %v1205_v0 = vpop.permute.xlu0 %144  ;;  %v344_v16 = vmul.f32 %v1214_v3, %v287_v63  ;;  %v679_v63 = vld [vmem:[%s1386_s5 + $0x48] sm:$0xff] }
  0xad   :  { %698 = vperm.xlu1 %937, %v672_v61  }
  0xae   :  { %v360_v28 = vadd.f32 %v344_v16, %v260_v22 }
  0xb0   :  { %v100_v7 = vpop.permute.xlu1 %99  ;;  %v1223_v8 = vpop.permute.xlu0 %154  ;;  %v376_v38 = vmax.f32 %v360_v28, 0.0  ;;  %v806_v28 = vld [vmem:[%s1387_s6] sm:$0x3] }
  0xb1   :  { %703 = vperm.xlu1 %937, %v673_v4   ;;  %v165_v35 = vmul.f32 %v1211_v2, %v100_v7  ;;  %v426_v4 = vld [vmem:[%s1385_s4 + $0x68] sm:$0xff]  ;;  %v680_v7 = vld [vmem:[%s1386_s5 + $0x50] sm:$0xff] }
  0xb2   :  { %496 = vperm.xlu0 %938, %v426_v4  }
  0xb4   :  { %v200_v15 = vpop.permute.xlu1 %199 }
  0xb5   :  { %v275_v17 = vpop.permute.xlu0 %274  ;;  %708 = vperm.xlu1 %937, %v674_v11   ;;  %v261_v39 = vadd.f32 %v200_v15, %v165_v35 }
  0xb6   :  { %v341_v20 = vmul.f32 %v1214_v3, %v275_v17  ;;  %501 = vperm.xlu0 %938, %v427_v12  }
  0xb8   :  { %v357_v25 = vadd.f32 %v341_v20, %v257_v18  ;;  %v205_v26 = vpop.permute.xlu1 %204 }
  0xb9   :  { %v283_v29 = vpop.permute.xlu0 %282  ;;  %713 = vperm.xlu1 %937, %v675_v21   ;;  %v262_v43 = vadd.f32 %v205_v26, %v166_v27 }
  0xba   :  { %v373_v32 = vmax.f32 %v357_v25, 0.0  ;;  %v343_v33 = vmul.f32 %v1214_v3, %v283_v29  ;;  %506 = vperm.xlu0 %938, %v428_v45   ;;  %v683_v25 = vld [vmem:[%s1386_s5 + $0x68] sm:$0xff]  ;;  %v685_v29 = vld [vmem:[%s1386_s5 + $0x78] sm:$0xff] }
  0xbc   :  { %v405_v36 = vpack.c.bf16 %v374_v30, %v373_v32  ;;  %v359_v37 = vadd.f32 %v343_v33, %v259_v31 }
  0xbd   :  { %v291_v40 = vpop.permute.xlu0 %290  ;;  %v295_v41 = vpop.permute.xlu1 %294  ;;  %718 = vperm.xlu1 %937, %v676_v34   ;;  %v170_v34 = vmul.f32 %v1211_v2, %v1184_v52 }
  0xbe   :  { %v375_v44 = vmax.f32 %v359_v37, 0.0  ;;  %v345_v46 = vmul.f32 %v1214_v3, %v291_v40  ;;  %v346_v47 = vmul.f32 %v1214_v3, %v295_v41  ;;  %867 = vmatprep.subr.bf16.mxu0 %v405_v36  ;;  %899 = vmatprep.subr.bf16.mxu1 %v405_v36 }
  0xbf   :  { %868 = vmatpush3.bf16.msra.mxu0 %v405_v36  ;;  %907 = vmatpush3.bf16.msra.mxu1 %v405_v36 }
  0xc0   :  { %v406_v49 = vpack.c.bf16 %v376_v38, %v375_v44  ;;  %v361_v50 = vadd.f32 %v345_v46, %v261_v39  ;;  %v362_v51 = vadd.f32 %v346_v47, %v262_v43  ;;  %758 = vperm.xlu0 %938, %v684_v24  }
  0xc1   :  { %723 = vperm.xlu1 %937, %v677_v48   ;;  %v299_v1 = vpop.permute.xlu0 %298 }
  0xc2   :  { %v377_v54 = vmax.f32 %v361_v50, 0.0  ;;  %v378_v55 = vmax.f32 %v362_v51, 0.0  ;;  %v110_v56 = vpop.permute.xlu1 %109  ;;  %869 = vmatprep.subr.bf16.mxu0 %v406_v49  ;;  %900 = vmatprep.subr.bf16.mxu1 %v406_v49  ;;  %v347_v10 = vmul.f32 %v1214_v3, %v299_v1  ;;  %v172_v50 = vmul.f32 %v1211_v2, %v1195_v58 }
  0xc3   :  { %870 = vmatpush3.bf16.msra.mxu0 %v406_v49  ;;  %908 = vmatpush3.bf16.msra.mxu1 %v406_v49  ;;  %v167_v5 = vmul.f32 %v1211_v2, %v110_v56 }
  0xc4   :  { %v407_v59 = vpack.c.bf16 %v378_v55, %v377_v54  ;;  %809 = vperm.xlu0 %938, %v806_v28  }
  0xc5   :  { %728 = vperm.xlu1 %937, %v678_v57   ;;  %v307_v27 = vpop.permute.xlu0 %306 }
  0xc6   :  { %v210_v61 = vpop.permute.xlu1 %209  ;;  %871 = vmatprep.subr.bf16.mxu0 %v407_v59  ;;  %901 = vmatprep.subr.bf16.mxu1 %v407_v59  ;;  %v349_v32 = vmul.f32 %v1214_v3, %v307_v27 }
  0xc7   :  { %872 = vmatpush3.bf16.msra.mxu0 %v407_v59  ;;  %909 = vmatpush3.bf16.msra.mxu1 %v407_v59  ;;  %v263_v11 = vadd.f32 %v210_v61, %v167_v5 }
  0xc9   :  { %733 = vperm.xlu1 %937, %v679_v63   ;;  %v363_v15 = vadd.f32 %v347_v10, %v263_v11  ;;  %v315_v46 = vpop.permute.xlu0 %314 }
  0xca   :  { %v215_v6 = vpop.permute.xlu1 %214  ;;  %v351_v52 = vmul.f32 %v1214_v3, %v315_v46 }
  0xcb   :  { %v264_v16 = vadd.f32 %v215_v6, %v168_v9  ;;  %v379_v20 = vmax.f32 %v363_v15, 0.0 }
  0xcd   :  { %738 = vperm.xlu1 %937, %v680_v7   ;;  %v323_v5 = vpop.permute.xlu0 %322  ;;  %v174_v7 = vmul.f32 %v1211_v2, %v1205_v0 }
  0xce   :  { %v353_v58 = vmul.f32 %v1214_v3, %v323_v5 }
  0xcf   :  { %v303_v14 = vpop.permute.xlu1 %302 }
  0xd0   :  { %v348_v17 = vmul.f32 %v1214_v3, %v303_v14 }
  0xd1   :  { %743 = vperm.xlu1 %937, %v681_v13  }
  0xd2   :  { %v364_v18 = vadd.f32 %v348_v17, %v264_v16 }
  0xd4   :  { %v380_v21 = vmax.f32 %v364_v18, 0.0  ;;  %v120_v22 = vpop.permute.xlu1 %119 }
  0xd5   :  { %748 = vperm.xlu1 %937, %v682_v19   ;;  %v169_v30 = vmul.f32 %v1211_v2, %v120_v22 }
  0xd6   :  { %v408_v23 = vpack.c.bf16 %v380_v21, %v379_v20  ;;  %v331_v20 = vpop.permute.xlu0 %330  ;;  %v176_v21 = vmul.f32 %v1211_v2, %v1223_v8  ;;  %v944_v8 = vld [vmem:[%s1384_s3 + $0x30] sm:$0xff]  }
  0xd7   :  { %v355_v22 = vmul.f32 %v1214_v3, %v331_v20 }
  0xd8   :  { %v220_v26 = vpop.permute.xlu1 %219  ;;  %873 = vmatprep.subr.bf16.mxu0 %v408_v23  ;;  %902 = vmatprep.subr.bf16.mxu1 %v408_v23 }
  0xd9   :  { %874 = vmatpush3.bf16.msra.mxu0 %v408_v23  ;;  %910 = vmatpush3.bf16.msra.mxu1 %v408_v23  ;;  %v265_v33 = vadd.f32 %v220_v26, %v169_v30 }
  0xda   :  { %753 = vperm.xlu1 %937, %v683_v25  }
  0xdb   :  { %v365_v36 = vadd.f32 %v349_v32, %v265_v33  ;;  %v945_v32 = vld [vmem:[%s1384_s3 + $0x18] sm:$0xff]  }
  0xdc   :  { %v225_v31 = vpop.permute.xlu1 %224  ;;  %v946_v33 = vld [vmem:[%s1384_s3 + $0x38] sm:$0xff]  }
  0xdd   :  { %v266_v37 = vadd.f32 %v225_v31, %v170_v34  ;;  %v381_v40 = vmax.f32 %v365_v36, 0.0  ;;  %v941_v31 = vld [vmem:[%s1384_s3 + $0x8] sm:$0xff]   ;;  %v437_v34 = vpop.permute.xlu0 %436 }
  0xde   :  { %763 = vperm.xlu1 %937, %v685_v29  }
  0xe1   :  { %v311_v35 = vpop.permute.xlu1 %310 }
  0xe2   :  { %v350_v38 = vmul.f32 %v1214_v3, %v311_v35  ;;  %v452_v35 = vpop.permute.xlu0 %451 }
  0xe4   :  { %v366_v39 = vadd.f32 %v350_v38, %v266_v37 }
  0xe6   :  { %v382_v41 = vmax.f32 %v366_v39, 0.0  ;;  %v130_v42 = vpop.permute.xlu1 %129  ;;  %v694_v37 = vpop.permute.xlu0 %693 }
  0xe7   :  { %v171_v47 = vmul.f32 %v1211_v2, %v130_v42 }
  0xe8   :  { %v409_v43 = vpack.c.bf16 %v382_v41, %v381_v40 }
  0xea   :  { %v230_v44 = vpop.permute.xlu1 %229  ;;  %875 = vmatprep.subr.bf16.mxu0 %v409_v43  ;;  %903 = vmatprep.subr.bf16.mxu1 %v409_v43  ;;  %v457_v39 = vpop.permute.xlu0 %456 }
  0xeb   :  { %876 = vmatpush3.bf16.msra.mxu0 %v409_v43  ;;  %911 = vmatpush3.bf16.msra.mxu1 %v409_v43  ;;  %v267_v49 = vadd.f32 %v230_v44, %v171_v47 }
  0xed   :  { %v367_v53 = vadd.f32 %v351_v52, %v267_v49 }
  0xee   :  { %v235_v48 = vpop.permute.xlu1 %234  ;;  %v462_v41 = vpop.permute.xlu0 %461 }
  0xef   :  { %v268_v54 = vadd.f32 %v235_v48, %v172_v50  ;;  %v383_v57 = vmax.f32 %v367_v53, 0.0 }
  0xf2   :  { %v467_v43 = vpop.permute.xlu0 %466 }
  0xf3   :  { %v319_v51 = vpop.permute.xlu1 %318 }
  0xf4   :  { %v352_v55 = vmul.f32 %v1214_v3, %v319_v51 }
  0xf6   :  { %v368_v56 = vadd.f32 %v352_v55, %v268_v54  ;;  %v472_v46 = vpop.permute.xlu0 %471 }
  0xf8   :  { %v384_v59 = vmax.f32 %v368_v56, 0.0  ;;  %v140_v60 = vpop.permute.xlu1 %139 }
  0xf9   :  { %v173_v1 = vmul.f32 %v1211_v2, %v140_v60 }
  0xfa   :  { %v410_v61 = vpack.c.bf16 %v384_v59, %v383_v57  ;;  %v477_v48 = vpop.permute.xlu0 %476 }
  0xfc   :  { %v240_v63 = vpop.permute.xlu1 %239  ;;  %877 = vmatprep.subr.bf16.mxu0 %v410_v61  ;;  %904 = vmatprep.subr.bf16.mxu1 %v410_v61 }
  0xfd   :  { %878 = vmatpush3.bf16.msra.mxu0 %v410_v61  ;;  %912 = vmatpush3.bf16.msra.mxu1 %v410_v61  ;;  %v269_v6 = vadd.f32 %v240_v63, %v173_v1 }
  0xfe   :  { %v482_v49 = vpop.permute.xlu0 %481 }
  0xff   :  { %v369_v10 = vadd.f32 %v353_v58, %v269_v6 }
 0x100   :  { %v245_v4 = vpop.permute.xlu1 %244 }
 0x101   :  { %v270_v11 = vadd.f32 %v245_v4, %v174_v7  ;;  %v385_v14 = vmax.f32 %v369_v10, 0.0 }
 0x102   :  { %v1344_v51 = vpop.permute.xlu0 %486 }
 0x105   :  { %v327_v9 = vpop.permute.xlu1 %326 }
 0x106   :  { %v354_v12 = vmul.f32 %v1214_v3, %v327_v9  ;;  %v1346_v54 = vpop.permute.xlu0 %491 }
 0x108   :  { %v370_v13 = vadd.f32 %v354_v12, %v270_v11 }
 0x10a   :  { %v386_v15 = vmax.f32 %v370_v13, 0.0  ;;  %v150_v16 = vpop.permute.xlu1 %149 }
 0x10b   :  { %v175_v18 = vmul.f32 %v1211_v2, %v150_v16  ;;  %v942_v2 = vld [vmem:[%s1384_s3 + $0x28] sm:$0xff]  }
 0x10c   :  { %v411_v17 = vpack.c.bf16 %v386_v15, %v385_v14 }
 0x10e   :  { %v250_v45 = vpop.permute.xlu1 %249  ;;  %879 = vmatprep.subr.bf16.mxu0 %v411_v17  ;;  %905 = vmatprep.subr.bf16.mxu1 %v411_v17 }
 0x10f   :  { %880 = vmatpush3.bf16.msra.mxu0 %v411_v17  ;;  %913 = vmatpush3.bf16.msra.mxu1 %v411_v17  ;;  %v271_v0 = vadd.f32 %v250_v45, %v175_v18 }
 0x111   :  { %v371_v24 = vadd.f32 %v355_v22, %v271_v0 }
 0x112   :  { %v255_v19 = vpop.permute.xlu1 %254 }
 0x113   :  { %v272_v25 = vadd.f32 %v255_v19, %v176_v21  ;;  %v387_v28 = vmax.f32 %v371_v24, 0.0 }
 0x117   :  { %v335_v23 = vpop.permute.xlu1 %334 }
 0x118   :  { %v356_v26 = vmul.f32 %v1214_v3, %v335_v23  ;;  %v943_v3 = vld [vmem:[%s1384_s3 + $0x10] sm:$0xff]   ;;  %s803_s3 = sld [smem:[#allocation2]] }
 0x11a   :  { %v372_v27 = vadd.f32 %v356_v26, %v272_v25 }
 0x11c   :  { %v388_v29 = vmax.f32 %v372_v27, 0.0  ;;  %v432_v36 = vpop.permute.xlu1 %431 }
 0x11e   :  { %v412_v30 = vpack.c.bf16 %v388_v29, %v387_v28 }
 0x120   :  { %881 = vmatprep.subr.bf16.mxu0 %v412_v30  ;;  %906 = vmatprep.subr.bf16.mxu1 %v412_v30  ;;  %v442_v38 = vpop.permute.xlu1 %441 }
 0x121   :  { %882 = vmatpush3.bf16.msra.mxu0 %v412_v30  ;;  %914 = vmatpush3.bf16.msra.mxu1 %v412_v30 }
 0x124   :  { %884 = vmatmul.mubr.bf16.vlgmr.msra.gmra.mrb[0].mxu0 %v941_v31  ;;  %892 = vmatmul.mubr.bf16.vlgmr.msra.gmra.mrb[0].mxu1 %v942_v2  ;;  %v447_v40 = vpop.permute.xlu1 %446 }
 0x125   :  { %887 = vmatprep.mubr.bf16.mxu0 %v943_v3  ;;  %895 = vmatprep.mubr.bf16.mxu1 %v944_v8 }
 0x128   :  { %v689_v42 = vpop.permute.xlu1 %688 }
 0x12c   :  { %888 = vmatmul.mubr.bf16.gmra.mrb[4].mxu0 %v945_v32  ;;  %896 = vmatmul.mubr.bf16.gmra.mrb[4].mxu1 %v946_v33  ;;  %v699_v44 = vpop.permute.xlu1 %698 }
 0x130   :  { %v704_v47 = vpop.permute.xlu1 %703 }
 0x131   :  { %v1348_v56 = vpop.permute.xlu0 %496 }
 0x134   :  { %v709_v52 = vpop.permute.xlu1 %708 }
 0x135   :  { %v1352_v59 = vpop.permute.xlu0 %501 }
 0x138   :  { %v714_v50 = vpop.permute.xlu1 %713 }
 0x139   :  { %v1356_v61 = vpop.permute.xlu0 %506 }
 0x13c   :  { %v719_v53 = vpop.permute.xlu1 %718 }
 0x13f   :  { %v1358_v45 = vpop.permute.xlu0 %758 }
 0x140   :  { %v724_v55 = vpop.permute.xlu1 %723 }
 0x144   :  { %v1350_v57 = vpop.permute.xlu1 %728 }
 0x148   :  { %v1354_v60 = vpop.permute.xlu1 %733 }
 0x14c   :  { %v739_v17 = vpop.permute.xlu1 %738 }
 0x1f7   :  { %v885_v63 = vpop.f32.mrb[0].mxu0  ;;  %v893_v1 = vpop.f32.mrb[0].mxu1 }
 0x1f8   :  { %v591_v4 = vpop.f32.mrb[1].mxu0  ;;  %v623_v5 = vpop.f32.mrb[1].mxu1  ;;  %v600_v58 = vadd.f32 %v885_v63, %v442_v38 }
 0x1f9   :  { %v592_v6 = vadd.f32 %v591_v4, %v432_v36  ;;  %v886_v7 = vpop.f32.mrb[2].mxu0  ;;  %v894_v9 = vpop.f32.mrb[2].mxu1 }
 0x1fa   :  { %v603_v10 = vadd.f32 %v886_v7, %v447_v40  ;;  %v594_v11 = vpop.f32.mrb[3].mxu0  ;;  %v626_v12 = vpop.f32.mrb[3].mxu1  ;;  %v656_v15 = vmax.f32 %v600_v58, 0.0  ;;  %v632_v58 = vadd.f32 %v893_v1, %v482_v49 }
 0x1fb   :  { %v654_v13 = vmax.f32 %v592_v6, 0.0  ;;  %v595_v14 = vadd.f32 %v594_v11, %v437_v34  ;;  %v624_v34 = vadd.f32 %v623_v5, %v472_v46  ;;  %v627_v63 = vadd.f32 %v626_v12, %v477_v48 }
 0x1fc   :  { %v657_v18 = vmax.f32 %v603_v10, 0.0  ;;  %v768_v24 = vmul.f32 %v699_v44, %v656_v15  ;;  %v664_v5 = vmax.f32 %v632_v58, 0.0 }
 0x1fd   :  { %v655_v16 = vmax.f32 %v595_v14, 0.0  ;;  %v766_v19 = vmul.f32 %v689_v42, %v654_v13  ;;  %v810_v42 = vpop.permute.xlu0 %809  ;;  %v662_v6 = vmax.f32 %v624_v34, 0.0  ;;  %v822_v34 = vstv %s850_s2 }
 0x1fe   :  { %v769_v30 = vmul.f32 %v704_v47, %v657_v18  ;;  %v812_v10 = vmul.f32 %v810_v42, %v1203_v62  ;;  %v776_v62 = vmul.f32 %v739_v17, %v664_v5 }
 0x1ff   :  { %v767_v20 = vmul.f32 %v694_v37, %v655_v16  ;;  %v889_v0 = vpop.f32.mrb[4].mxu0  ;;  %v897_v21 = vpop.f32.mrb[4].mxu1  ;;  %v774_v11 = vmul.f32 %v1350_v57, %v662_v6 }
 0x200   :  { %v607_v22 = vpop.f32.mrb[5].mxu0  ;;  %v639_v23 = vpop.f32.mrb[5].mxu1  ;;  %v616_v26 = vadd.f32 %v889_v0, %v462_v41  ;;  %v814_v13 = vsel %vm813_vm0, %v812_v10, 0.0 }
 0x201   :  { %v782_v25 = vadd.f32 %v767_v20, %v766_v19  ;;  %v608_v27 = vadd.f32 %v607_v22, %v452_v35  ;;  %v890_v28 = vpop.f32.mrb[6].mxu0  ;;  %v898_v29 = vpop.f32.mrb[6].mxu1  ;;  %v640_v48 = vadd.f32 %v639_v23, %v1346_v54  ;;  %v815_v15 = vrot.slane %v814_v13, 4 }
 0x202   :  { %v610_v31 = vpop.f32.mrb[7].mxu0  ;;  %v642_v2 = vpop.f32.mrb[7].mxu1  ;;  %v619_v32 = vadd.f32 %v890_v28, %v467_v43  ;;  %v660_v36 = vmax.f32 %v616_v26, 0.0  ;;  %v663_v43 = vmax.f32 %v627_v63, 0.0  ;;  %v651_v57 = vadd.f32 %v898_v29, %v1356_v61 }
 0x203   :  { %v783_v3 = vadd.f32 %v782_v25, %v768_v24  ;;  %v658_v8 = vmax.f32 %v608_v27, 0.0  ;;  %v611_v33 = vadd.f32 %v610_v31, %v457_v39  ;;  %v744_v35 = vpop.permute.xlu1 %743  ;;  %v635_v39 = vadd.f32 %v894_v9, %v1344_v51 }
 0x204   :  { %v661_v4 = vmax.f32 %v619_v32, 0.0  ;;  %v772_v47 = vmul.f32 %v719_v53, %v660_v36  ;;  %v775_v53 = vmul.f32 %v1354_v60, %v663_v43  ;;  %v643_v14 = vadd.f32 %v642_v2, %v1348_v56 }
 0x205   :  { %v770_v37 = vmul.f32 %v709_v52, %v658_v8  ;;  %v784_v38 = vadd.f32 %v783_v3, %v769_v30  ;;  %v659_v40 = vmax.f32 %v611_v33, 0.0  ;;  %v665_v49 = vmax.f32 %v635_v39, 0.0 }
 0x206   :  { %v773_v46 = vmul.f32 %v724_v55, %v661_v4  ;;  %v648_v51 = vadd.f32 %v897_v21, %v1352_v59  ;;  %v666_v9 = vmax.f32 %v640_v48, 0.0  ;;  %v667_v18 = vmax.f32 %v643_v14, 0.0 }
 0x207   :  { %v785_v44 = vadd.f32 %v784_v38, %v770_v37  ;;  %v771_v41 = vmul.f32 %v714_v50, %v659_v40  ;;  %v749_v50 = vpop.permute.xlu1 %748  ;;  %v777_v16 = vmul.f32 %v744_v35, %v665_v49  ;;  %v816_v23 = vadd.f32 %v815_v15, %v814_v13 }
 0x208   :  { %v668_v20 = vmax.f32 %v648_v51, 0.0  ;;  %v778_v0 = vmul.f32 %v749_v50, %v666_v9  ;;  %v669_v60 = vmax.f32 %v651_v57, 0.0  ;;  %v804_v33 = vstv %s803_s3 }
 0x209   :  { %v786_v7 = vadd.f32 %v785_v44, %v771_v41  ;;  %v817_v21 = vrot.slane %v816_v23, 2 }
 0x20a   :  { %v780_v56 = vmul.f32 %v1358_v45, %v668_v20 }
 0x20b   :  { %v787_v52 = vadd.f32 %v786_v7, %v772_v47  ;;  %v754_v19 = vpop.permute.xlu1 %753  ;;  %v818_v30 = vadd.f32 %v817_v21, %v816_v23 }
 0x20c   :  { %v779_v24 = vmul.f32 %v754_v19, %v667_v18 }
 0x20d   :  { %v788_v12 = vadd.f32 %v787_v52, %v773_v46  ;;  %v819_v31 = vrot.slane %v818_v30, 1 }
 0x20f   :  { %v789_v1 = vadd.f32 %v788_v12, %v774_v11  ;;  %v764_v59 = vpop.permute.xlu1 %763  ;;  %v820_v32 = vadd.f32 %v819_v31, %v818_v30 }
 0x210   :  { %v781_v26 = vmul.f32 %v764_v59, %v669_v60 }
 0x211   :  { %v790_v55 = vadd.f32 %v789_v1, %v775_v53  ;;  %v823_v37 = vadd.f32 %v822_v34, %v820_v32 }
 0x213   :  { %v791_v54 = vadd.f32 %v790_v55, %v776_v62 }
 0x215   :  { %v792_v22 = vadd.f32 %v791_v54, %v777_v16 }
 0x217   :  { %v793_v25 = vadd.f32 %v792_v22, %v778_v0 }
 0x219   :  { %v794_v17 = vadd.f32 %v793_v25, %v779_v24 }
 0x21b   :  { %v795_v27 = vadd.f32 %v794_v17, %v780_v56 }
 0x21d   :  { %v796_v28 = vadd.f32 %v795_v27, %v781_v26 }
 0x21f   :  { %v797_v61 = vrot.slane %v796_v28, 4 }
 0x221   :  { %v798_v29 = vadd.f32 %v797_v61, %v796_v28 }
 0x223   :  { %v799_v2 = vrot.slane %v798_v29, 2 }
 0x225   :  { %v800_v3 = vadd.f32 %v799_v2, %v798_v29 }
 0x227   :  { %v801_v8 = vrot.slane %v800_v3, 1 }
 0x229   :  { %v802_v36 = vadd.f32 %v801_v8, %v800_v3 }
 0x22b   :  { %v805_v45 = vadd.f32 %v804_v33, %v802_v36 }
 0x22d   :  { %v825_v38 = vsel %vm824_vm1, %v805_v45, %v823_v37 }
 0x22e   :  { %826 = vst [vmem:[#allocation5] sm:$0x3] %v825_v38 }
 0x22f   :  { %970 = shalt.err (!%p967_p9)
}
 0x230   :  { %s971_s12 = scalar_lea.hbm %s1389_s8, 32 }
 0x231   :  { %p972_p10 = scmp.ne.s32.totalorder %s1389_s8, %s971_s12  ;;  %p975_p11 = scmp.lt.u32.totalorder %s971_s12, %s1389_s8 }
 0x233   :  { %p977_p12 = pnand %p975_p11, %p972_p10 }
 0x235   :  { %980 = shalt.err (!%p977_p12)
}
 0x236   :  { %836 = dma.vmem_to_hbm [thread:$0]  %s834_s30, 32, %s1389_s8, [#allocation3]  }
 0x237   :  { %983 = dma.done.wait [#allocation3], 32  }
 0x238   :  { %984 = vsyncadd [#allocation3], 4294967264 }
 0x239   :  { %840 = vsyncpa [#allocation3], 1 }
 0x23a   :  { %841 = vsyncpa [#allocation4], 1 }

// kernel: tpu_custom_call.1
= control target key start
LH: loop header
LB: loop body
LE: loop exit
PB: predicated region body
PF: predicated region fallthrough
CT: control target
= control target key end

     0   :  { %13 = vsyncpa [#allocation4], 0  ;;  %s1381_s0 = inlined_call_operand.vmem [shape: f32[2,128], index: 0, kind: input, shape index: {}]   ;;  %s1382_s1 = inlined_call_operand.vmem [shape: f32[128,2], index: 1, kind: input, shape index: {}]   ;;  %s1383_s2 = inlined_call_operand.vmem [shape: f32[128,1], index: 2, kind: input, shape index: {}]   ;;  %s1384_s3 = inlined_call_operand.vmem [shape: bf16[128,128], index: 3, kind: input, shape index: {}]   ;;  %s1385_s4 = inlined_call_operand.vmem [shape: f32[128,1], index: 4, kind: input, shape index: {}]   ;;  %s1386_s5 = inlined_call_operand.vmem [shape: f32[128,1], index: 5, kind: input, shape index: {}]   ;;  %s1387_s6 = inlined_call_operand.vmem [shape: f32[2,1], index: 6, kind: input, shape index: {}]   ;;  %s1388_s7 = inlined_call_operand.vmem [shape: f32[2], index: 7, kind: input, shape index: {}]   ;;  %s1389_s8 = inlined_call_operand.hbm [shape: f32[2,128], index: 8, kind: output, shape index: {}]  }
   0x1   :  { %14 = vsyncpa [#allocation3], 0  ;;  %s35_s29 = sshll.u32 %s1388_s7, 4  ;;  %s36_s29 = int_to_ptr.vmem [resolvable:$true] %s35_s29 }
   0x2   :  { %s947_s30 = scalar_lea.vmem %s36_s29, 16  ;;  %p952_p1 = scmp.lt.s32.totalorder %s36_s29, %s36_s29 }
   0x3   :  { %p948_p0 = scmp.ne.s32.totalorder %s36_s29, %s947_s30  ;;  %p953_p2 = scmp.lt.s32.totalorder %s947_s30, %s947_s30 }
   0x5   :  { %p954_p3 = por %p953_p2, %p952_p1 }
   0x7   :  { %p955_p4 = pnand %p954_p3, %p948_p0 }
   0x9   :  { %958 = shalt.err (!%p955_p4)
}
   0xa   :  { %s985_s9 = smov [#allocation2]  }
   0xb   :  { %38 = dma.vmem_to_smem %s36_s29, 16, %s985_s9, [#allocation4]  }
   0xc   :  { %981 = dma.done.wait [#allocation4], 16  }
   0xd   :  { %982 = vsyncadd [#allocation4], 4294967280 }
   0xe   :  { %42 = sfence }
   0xf   :  { %v61_v0 = vld [vmem:[%s1382_s1] sm:$0xff]  ;;  %v986_v2 = vmov 0   ;;  %v62_v3 = vld [vmem:[%s1382_s1 + $0x8] sm:$0xff]  ;;  %v64_v5 = vld [vmem:[%s1382_s1 + $0x18] sm:$0xff]  ;;  %v987_v6 = vmov 1   ;;  %v157_v49 = vlaneseq  ;;  %vm813_vm0 = vcmask 1041408  }
  0x10   :  { %v45_v1 = vld [vmem:[%s1383_s2] sm:$0xff]  ;;  %920 = vset.pattern.permute.xlu1 %v986_v2  ;;  %919 = vset.pattern.permute.xlu0 %v986_v2  ;;  %v46_v4 = vld [vmem:[%s1383_s2 + $0x8] sm:$0xff]  ;;  %v63_v8 = vld [vmem:[%s1382_s1 + $0x10] sm:$0xff]  ;;  %s988_s29 = smov [#allocation5]   ;;  %vm824_vm1 = vcmask 1040384  }
  0x11   :  { %79 = vperm.xlu0 %919, %v61_v0   ;;  %179 = vperm.xlu1 %920, %v45_v1   ;;  %v66_v7 = vld [vmem:[%s1382_s1 + $0x28] sm:$0xff]  ;;  %v68_v9 = vld [vmem:[%s1382_s1 + $0x38] sm:$0xff]  ;;  %v47_v10 = vld [vmem:[%s1383_s2 + $0x10] sm:$0xff]  ;;  %v158_v54 = vshrl.u32 %v157_v49, 7  ;;  %s833_s30 = sshll.u32 %s988_s29, 4  ;;  %s834_s30 = int_to_ptr.vmem [resolvable:$true] %s833_s30 }
  0x12   :  { %v70_v11 = vld [vmem:[%s1382_s1 + $0x48] sm:$0xff]  ;;  %v48_v12 = vld [vmem:[%s1383_s2 + $0x18] sm:$0xff]  ;;  %v65_v16 = vld [vmem:[%s1382_s1 + $0x20] sm:$0xff]  ;;  %s959_s9 = scalar_lea.vmem %s834_s30, 32  ;;  %p964_p6 = scmp.lt.s32.totalorder %s834_s30, %s834_s30 }
  0x13   :  { %v72_v13 = vld [vmem:[%s1382_s1 + $0x58] sm:$0xff]  ;;  %v74_v14 = vld [vmem:[%s1382_s1 + $0x68] sm:$0xff]  ;;  %v49_v17 = vld [vmem:[%s1383_s2 + $0x20] sm:$0xff]  ;;  %v159_v59 = vsub.s32 0, %v158_v54  ;;  %v339_v60 = vsub.s32 1, %v158_v54  ;;  %p960_p5 = scmp.ne.s32.totalorder %s834_s30, %s959_s9  ;;  %p965_p7 = scmp.lt.s32.totalorder %s959_s9, %s959_s9 }
  0x14   :  { %v1084_v15 = vld [vmem:[%s1382_s1 + $0x78] sm:$0xff]  ;;  %v50_v18 = vld [vmem:[%s1383_s2 + $0x28] sm:$0xff]  ;;  %v67_v19 = vld [vmem:[%s1382_s1 + $0x30] sm:$0xff] }
  0x15   :  { %84 = vperm.xlu0 %919, %v62_v3   ;;  %184 = vperm.xlu1 %920, %v46_v4   ;;  %v51_v20 = vld [vmem:[%s1383_s2 + $0x30] sm:$0xff]  ;;  %v69_v21 = vld [vmem:[%s1382_s1 + $0x40] sm:$0xff]  ;;  %v52_v22 = vld [vmem:[%s1383_s2 + $0x38] sm:$0xff]  ;;  %p966_p8 = por %p965_p7, %p964_p6 }
  0x16   :  { %v71_v23 = vld [vmem:[%s1382_s1 + $0x50] sm:$0xff]  ;;  %v73_v24 = vld [vmem:[%s1382_s1 + $0x60] sm:$0xff]  ;;  %v54_v27 = vld [vmem:[%s1383_s2 + $0x48] sm:$0xff] }
  0x17   :  { %v75_v25 = vld [vmem:[%s1382_s1 + $0x70] sm:$0xff]  ;;  %v53_v26 = vld [vmem:[%s1383_s2 + $0x40] sm:$0xff]  ;;  %v56_v29 = vld [vmem:[%s1383_s2 + $0x58] sm:$0xff]  ;;  %p967_p9 = pnand %p966_p8, %p960_p5 }
  0x18   :  { %v55_v28 = vld [vmem:[%s1383_s2 + $0x50] sm:$0xff]  ;;  %v57_v30 = vld [vmem:[%s1383_s2 + $0x60] sm:$0xff]  ;;  %v58_v31 = vld [vmem:[%s1383_s2 + $0x68] sm:$0xff] }
  0x19   :  { %94 = vperm.xlu0 %919, %v64_v5   ;;  %921 = vset.pattern.permute.xlu1 %v987_v6  ;;  %v59_v32 = vld [vmem:[%s1383_s2 + $0x70] sm:$0xff]  ;;  %v60_v35 = vld [vmem:[%s1383_s2 + $0x78] sm:$0xff]  ;;  %v413_v40 = vld [vmem:[%s1385_s4] sm:$0xff]  ;;  %s850_s2 = sld [smem:[#allocation2 + $0x1]] }
  0x1a   :  { %278 = vperm.xlu1 %921, %v62_v3   ;;  %v414_v42 = vld [vmem:[%s1385_s4 + $0x8] sm:$0xff]  ;;  %v415_v44 = vld [vmem:[%s1385_s4 + $0x10] sm:$0xff]  ;;  %v417_v46 = vld [vmem:[%s1385_s4 + $0x20] sm:$0xff] }
  0x1b   :  { %v939_v47 = vld [vmem:[%s1384_s3] sm:$0xff]   ;;  %v416_v51 = vld [vmem:[%s1385_s4 + $0x18] sm:$0xff]  ;;  %v671_v53 = vld [vmem:[%s1386_s5 + $0x8] sm:$0xff] }
  0x1c   :  { %v940_v48 = vld [vmem:[%s1384_s3 + $0x20] sm:$0xff]   ;;  %883 = vmatprep.mubr.bf16.mxu0 %v939_v47  ;;  %v418_v57 = vld [vmem:[%s1385_s4 + $0x28] sm:$0xff]  ;;  %v672_v61 = vld [vmem:[%s1386_s5 + $0x10] sm:$0xff] }
  0x1d   :  { %104 = vperm.xlu0 %919, %v66_v7   ;;  %891 = vmatprep.mubr.bf16.mxu1 %v940_v48  ;;  %v670_v56 = vld [vmem:[%s1386_s5] sm:$0xff]  ;;  %v419_v1 = vld [vmem:[%s1385_s4 + $0x30] sm:$0xff]  ;;  %v673_v4 = vld [vmem:[%s1386_s5 + $0x18] sm:$0xff] }
  0x1e   :  { %922 = vset.pattern.permute.xlu1 %v986_v2  ;;  %v1203_v62 = vld [vmem:[%s1381_s0] sm:$0x3]  ;;  %v677_v48 = vld [vmem:[%s1386_s5 + $0x38] sm:$0xff] }
  0x1f   :  { %89 = vperm.xlu1 %922, %v63_v8   ;;  %v1214_v3 = vrot.slane %v1203_v62, %v339_v60  ;;  %v425_v60 = vld [vmem:[%s1385_s4 + $0x60] sm:$0xff] }
  0x21   :  { %114 = vperm.xlu0 %919, %v68_v9  }
  0x23   :  { %189 = vperm.xlu1 %922, %v47_v10  }
  0x25   :  { %124 = vperm.xlu0 %919, %v70_v11  }
  0x27   :  { %194 = vperm.xlu1 %922, %v48_v12  }
  0x29   :  { %134 = vperm.xlu0 %919, %v72_v13  }
  0x2b   :  { %923 = vset.pattern.permute.xlu1 %v987_v6 }
  0x2c   :  { %286 = vperm.xlu1 %923, %v64_v5   ;;  %v420_v5 = vld [vmem:[%s1385_s4 + $0x38] sm:$0xff] }
  0x2d   :  { %144 = vperm.xlu0 %919, %v74_v14  }
  0x30   :  { %924 = vset.pattern.permute.xlu1 %v986_v2 }
  0x31   :  { %154 = vperm.xlu0 %919, %v1084_v15   ;;  %99 = vperm.xlu1 %924, %v65_v16  }
  0x35   :  { %935 = vset.pattern.permute.xlu0 %v987_v6  ;;  %199 = vperm.xlu1 %924, %v49_v17  }
  0x36   :  { %274 = vperm.xlu0 %935, %v61_v0  }
  0x39   :  { %204 = vperm.xlu1 %924, %v50_v18  }
  0x3a   :  { %282 = vperm.xlu0 %935, %v63_v8  }
  0x3d   :  { %925 = vset.pattern.permute.xlu1 %v987_v6 }
  0x3e   :  { %290 = vperm.xlu0 %935, %v65_v16   ;;  %294 = vperm.xlu1 %925, %v66_v7  }
  0x42   :  { %926 = vset.pattern.permute.xlu1 %v986_v2  ;;  %298 = vperm.xlu0 %935, %v67_v19  }
  0x43   :  { %109 = vperm.xlu1 %926, %v67_v19  }
  0x46   :  { %306 = vperm.xlu0 %935, %v69_v21  }
  0x47   :  { %209 = vperm.xlu1 %926, %v51_v20  }
  0x4a   :  { %314 = vperm.xlu0 %935, %v71_v23  }
  0x4b   :  { %214 = vperm.xlu1 %926, %v52_v22  }
  0x4e   :  { %322 = vperm.xlu0 %935, %v73_v24  }
  0x4f   :  { %927 = vset.pattern.permute.xlu1 %v987_v6 }
  0x50   :  { %302 = vperm.xlu1 %927, %v68_v9  }
  0x52   :  { %330 = vperm.xlu0 %935, %v75_v25  }
  0x54   :  { %928 = vset.pattern.permute.xlu1 %v986_v2 }
  0x55   :  { %119 = vperm.xlu1 %928, %v69_v21   ;;  %v675_v21 = vld [vmem:[%s1386_s5 + $0x28] sm:$0xff] }
  0x56   :  { %938 = vset.pattern.permute.xlu0 %v986_v2 }
  0x57   :  { %436 = vperm.xlu0 %938, %v414_v42   ;;  %v423_v42 = vld [vmem:[%s1385_s4 + $0x50] sm:$0xff] }
  0x59   :  { %219 = vperm.xlu1 %928, %v53_v26  }
  0x5b   :  { %451 = vperm.xlu0 %938, %v417_v46  }
  0x5d   :  { %224 = vperm.xlu1 %928, %v54_v27  }
  0x5f   :  { %693 = vperm.xlu0 %938, %v671_v53   ;;  %v424_v53 = vld [vmem:[%s1385_s4 + $0x58] sm:$0xff] }
  0x61   :  { %929 = vset.pattern.permute.xlu1 %v987_v6 }
  0x62   :  { %310 = vperm.xlu1 %929, %v70_v11   ;;  %v674_v11 = vld [vmem:[%s1386_s5 + $0x20] sm:$0xff] }
  0x63   :  { %456 = vperm.xlu0 %938, %v418_v57   ;;  %v678_v57 = vld [vmem:[%s1386_s5 + $0x40] sm:$0xff] }
  0x66   :  { %930 = vset.pattern.permute.xlu1 %v986_v2 }
  0x67   :  { %129 = vperm.xlu1 %930, %v71_v23   ;;  %461 = vperm.xlu0 %938, %v419_v1   ;;  %v422_v23 = vld [vmem:[%s1385_s4 + $0x48] sm:$0xff] }
  0x6b   :  { %229 = vperm.xlu1 %930, %v55_v28   ;;  %466 = vperm.xlu0 %938, %v420_v5  }
  0x6f   :  { %234 = vperm.xlu1 %930, %v56_v29  }
  0x73   :  { %931 = vset.pattern.permute.xlu1 %v987_v6 }
  0x74   :  { %318 = vperm.xlu1 %931, %v72_v13   ;;  %v421_v13 = vld [vmem:[%s1385_s4 + $0x40] sm:$0xff] }
  0x75   :  { %471 = vperm.xlu0 %938, %v421_v13   ;;  %v681_v13 = vld [vmem:[%s1386_s5 + $0x58] sm:$0xff] }
  0x78   :  { %932 = vset.pattern.permute.xlu1 %v986_v2 }
  0x79   :  { %139 = vperm.xlu1 %932, %v73_v24   ;;  %476 = vperm.xlu0 %938, %v422_v23  }
  0x7d   :  { %239 = vperm.xlu1 %932, %v57_v30   ;;  %481 = vperm.xlu0 %938, %v423_v42  }
  0x81   :  { %244 = vperm.xlu1 %932, %v58_v31   ;;  %486 = vperm.xlu0 %938, %v424_v53  }
  0x85   :  { %933 = vset.pattern.permute.xlu1 %v987_v6  ;;  %491 = vperm.xlu0 %938, %v425_v60  }
  0x86   :  { %326 = vperm.xlu1 %933, %v74_v14  }
  0x8a   :  { %934 = vset.pattern.permute.xlu1 %v986_v2 }
  0x8b   :  { %149 = vperm.xlu1 %934, %v75_v25  }
  0x8f   :  { %249 = vperm.xlu1 %934, %v59_v32  }
  0x90   :  { %v80_v33 = vpop.permute.xlu0 %79  ;;  %v1151_v34 = vpop.permute.xlu1 %179 }
  0x93   :  { %254 = vperm.xlu1 %934, %v60_v35  }
  0x94   :  { %v85_v36 = vpop.permute.xlu0 %84  ;;  %v185_v37 = vpop.permute.xlu1 %184 }
  0x97   :  { %936 = vset.pattern.permute.xlu1 %v987_v6 }
  0x98   :  { %334 = vperm.xlu1 %936, %v1084_v15   ;;  %v95_v38 = vpop.permute.xlu0 %94 }
  0x99   :  { %v279_v39 = vpop.permute.xlu1 %278 }
  0x9a   :  { %v342_v10 = vmul.f32 %v1214_v3, %v279_v39 }
  0x9c   :  { %v1161_v41 = vpop.permute.xlu0 %104  ;;  %937 = vset.pattern.permute.xlu1 %v986_v2  ;;  %v1211_v2 = vrot.slane %v1203_v62, %v159_v59 }
  0x9d   :  { %431 = vperm.xlu1 %937, %v413_v40  }
  0x9e   :  { %v90_v43 = vpop.permute.xlu1 %89  ;;  %v162_v6 = vmul.f32 %v1211_v2, %v85_v36  ;;  %v161_v9 = vmul.f32 %v1211_v2, %v80_v33  ;;  %v164_v12 = vmul.f32 %v1211_v2, %v95_v38  ;;  %v166_v27 = vmul.f32 %v1211_v2, %v1161_v41 }
  0x9f   :  { %v163_v24 = vmul.f32 %v1211_v2, %v90_v43 }
  0xa0   :  { %v1170_v45 = vpop.permute.xlu0 %114  ;;  %v258_v14 = vadd.f32 %v185_v37, %v162_v6  ;;  %v257_v18 = vadd.f32 %v1151_v34, %v161_v9  ;;  %v676_v34 = vld [vmem:[%s1386_s5 + $0x30] sm:$0xff] }
  0xa1   :  { %441 = vperm.xlu1 %937, %v415_v44   ;;  %v168_v9 = vmul.f32 %v1211_v2, %v1170_v45  ;;  %v428_v45 = vld [vmem:[%s1385_s4 + $0x78] sm:$0xff] }
  0xa2   :  { %v190_v50 = vpop.permute.xlu1 %189  ;;  %v358_v19 = vadd.f32 %v342_v10, %v258_v14 }
  0xa3   :  { %v259_v31 = vadd.f32 %v190_v50, %v163_v24  ;;  %v684_v24 = vld [vmem:[%s1386_s5 + $0x70] sm:$0xff] }
  0xa4   :  { %v1184_v52 = vpop.permute.xlu0 %124  ;;  %v374_v30 = vmax.f32 %v358_v19, 0.0  ;;  %v682_v19 = vld [vmem:[%s1386_s5 + $0x60] sm:$0xff] }
  0xa5   :  { %446 = vperm.xlu1 %937, %v416_v51  }
  0xa6   :  { %v195_v55 = vpop.permute.xlu1 %194 }
  0xa7   :  { %v260_v22 = vadd.f32 %v195_v55, %v164_v12  ;;  %v427_v12 = vld [vmem:[%s1385_s4 + $0x70] sm:$0xff] }
  0xa8   :  { %v1195_v58 = vpop.permute.xlu0 %134 }
  0xa9   :  { %688 = vperm.xlu1 %937, %v670_v56  }
  0xab   :  { %v287_v63 = vpop.permute.xlu1 %286 }
  0xac   :  { %v1205_v0 = vpop.permute.xlu0 %144  ;;  %v344_v16 = vmul.f32 %v1214_v3, %v287_v63  ;;  %v679_v63 = vld [vmem:[%s1386_s5 + $0x48] sm:$0xff] }
  0xad   :  { %698 = vperm.xlu1 %937, %v672_v61  }
  0xae   :  { %v360_v28 = vadd.f32 %v344_v16, %v260_v22 }
  0xb0   :  { %v100_v7 = vpop.permute.xlu1 %99  ;;  %v1223_v8 = vpop.permute.xlu0 %154  ;;  %v376_v38 = vmax.f32 %v360_v28, 0.0  ;;  %v806_v28 = vld [vmem:[%s1387_s6] sm:$0x3] }
  0xb1   :  { %703 = vperm.xlu1 %937, %v673_v4   ;;  %v165_v35 = vmul.f32 %v1211_v2, %v100_v7  ;;  %v426_v4 = vld [vmem:[%s1385_s4 + $0x68] sm:$0xff]  ;;  %v680_v7 = vld [vmem:[%s1386_s5 + $0x50] sm:$0xff] }
  0xb2   :  { %496 = vperm.xlu0 %938, %v426_v4  }
  0xb4   :  { %v200_v15 = vpop.permute.xlu1 %199 }
  0xb5   :  { %v275_v17 = vpop.permute.xlu0 %274  ;;  %708 = vperm.xlu1 %937, %v674_v11   ;;  %v261_v39 = vadd.f32 %v200_v15, %v165_v35 }
  0xb6   :  { %v341_v20 = vmul.f32 %v1214_v3, %v275_v17  ;;  %501 = vperm.xlu0 %938, %v427_v12  }
  0xb8   :  { %v357_v25 = vadd.f32 %v341_v20, %v257_v18  ;;  %v205_v26 = vpop.permute.xlu1 %204 }
  0xb9   :  { %v283_v29 = vpop.permute.xlu0 %282  ;;  %713 = vperm.xlu1 %937, %v675_v21   ;;  %v262_v43 = vadd.f32 %v205_v26, %v166_v27 }
  0xba   :  { %v373_v32 = vmax.f32 %v357_v25, 0.0  ;;  %v343_v33 = vmul.f32 %v1214_v3, %v283_v29  ;;  %506 = vperm.xlu0 %938, %v428_v45   ;;  %v683_v25 = vld [vmem:[%s1386_s5 + $0x68] sm:$0xff]  ;;  %v685_v29 = vld [vmem:[%s1386_s5 + $0x78] sm:$0xff] }
  0xbc   :  { %v405_v36 = vpack.c.bf16 %v374_v30, %v373_v32  ;;  %v359_v37 = vadd.f32 %v343_v33, %v259_v31 }
  0xbd   :  { %v291_v40 = vpop.permute.xlu0 %290  ;;  %v295_v41 = vpop.permute.xlu1 %294  ;;  %718 = vperm.xlu1 %937, %v676_v34   ;;  %v170_v34 = vmul.f32 %v1211_v2, %v1184_v52 }
  0xbe   :  { %v375_v44 = vmax.f32 %v359_v37, 0.0  ;;  %v345_v46 = vmul.f32 %v1214_v3, %v291_v40  ;;  %v346_v47 = vmul.f32 %v1214_v3, %v295_v41  ;;  %867 = vmatprep.subr.bf16.mxu0 %v405_v36  ;;  %899 = vmatprep.subr.bf16.mxu1 %v405_v36 }
  0xbf   :  { %868 = vmatpush3.bf16.msra.mxu0 %v405_v36  ;;  %907 = vmatpush3.bf16.msra.mxu1 %v405_v36 }
  0xc0   :  { %v406_v49 = vpack.c.bf16 %v376_v38, %v375_v44  ;;  %v361_v50 = vadd.f32 %v345_v46, %v261_v39  ;;  %v362_v51 = vadd.f32 %v346_v47, %v262_v43  ;;  %758 = vperm.xlu0 %938, %v684_v24  }
  0xc1   :  { %723 = vperm.xlu1 %937, %v677_v48   ;;  %v299_v1 = vpop.permute.xlu0 %298 }
  0xc2   :  { %v377_v54 = vmax.f32 %v361_v50, 0.0  ;;  %v378_v55 = vmax.f32 %v362_v51, 0.0  ;;  %v110_v56 = vpop.permute.xlu1 %109  ;;  %869 = vmatprep.subr.bf16.mxu0 %v406_v49  ;;  %900 = vmatprep.subr.bf16.mxu1 %v406_v49  ;;  %v347_v10 = vmul.f32 %v1214_v3, %v299_v1  ;;  %v172_v50 = vmul.f32 %v1211_v2, %v1195_v58 }
  0xc3   :  { %870 = vmatpush3.bf16.msra.mxu0 %v406_v49  ;;  %908 = vmatpush3.bf16.msra.mxu1 %v406_v49  ;;  %v167_v5 = vmul.f32 %v1211_v2, %v110_v56 }
  0xc4   :  { %v407_v59 = vpack.c.bf16 %v378_v55, %v377_v54  ;;  %809 = vperm.xlu0 %938, %v806_v28  }
  0xc5   :  { %728 = vperm.xlu1 %937, %v678_v57   ;;  %v307_v27 = vpop.permute.xlu0 %306 }
  0xc6   :  { %v210_v61 = vpop.permute.xlu1 %209  ;;  %871 = vmatprep.subr.bf16.mxu0 %v407_v59  ;;  %901 = vmatprep.subr.bf16.mxu1 %v407_v59  ;;  %v349_v32 = vmul.f32 %v1214_v3, %v307_v27 }
  0xc7   :  { %872 = vmatpush3.bf16.msra.mxu0 %v407_v59  ;;  %909 = vmatpush3.bf16.msra.mxu1 %v407_v59  ;;  %v263_v11 = vadd.f32 %v210_v61, %v167_v5 }
  0xc9   :  { %733 = vperm.xlu1 %937, %v679_v63   ;;  %v363_v15 = vadd.f32 %v347_v10, %v263_v11  ;;  %v315_v46 = vpop.permute.xlu0 %314 }
  0xca   :  { %v215_v6 = vpop.permute.xlu1 %214  ;;  %v351_v52 = vmul.f32 %v1214_v3, %v315_v46 }
  0xcb   :  { %v264_v16 = vadd.f32 %v215_v6, %v168_v9  ;;  %v379_v20 = vmax.f32 %v363_v15, 0.0 }
  0xcd   :  { %738 = vperm.xlu1 %937, %v680_v7   ;;  %v323_v5 = vpop.permute.xlu0 %322  ;;  %v174_v7 = vmul.f32 %v1211_v2, %v1205_v0 }
  0xce   :  { %v353_v58 = vmul.f32 %v1214_v3, %v323_v5 }
  0xcf   :  { %v303_v14 = vpop.permute.xlu1 %302 }
  0xd0   :  { %v348_v17 = vmul.f32 %v1214_v3, %v303_v14 }
  0xd1   :  { %743 = vperm.xlu1 %937, %v681_v13  }
  0xd2   :  { %v364_v18 = vadd.f32 %v348_v17, %v264_v16 }
  0xd4   :  { %v380_v21 = vmax.f32 %v364_v18, 0.0  ;;  %v120_v22 = vpop.permute.xlu1 %119 }
  0xd5   :  { %748 = vperm.xlu1 %937, %v682_v19   ;;  %v169_v30 = vmul.f32 %v1211_v2, %v120_v22 }
  0xd6   :  { %v408_v23 = vpack.c.bf16 %v380_v21, %v379_v20  ;;  %v331_v20 = vpop.permute.xlu0 %330  ;;  %v176_v21 = vmul.f32 %v1211_v2, %v1223_v8  ;;  %v944_v8 = vld [vmem:[%s1384_s3 + $0x30] sm:$0xff]  }
  0xd7   :  { %v355_v22 = vmul.f32 %v1214_v3, %v331_v20 }
  0xd8   :  { %v220_v26 = vpop.permute.xlu1 %219  ;;  %873 = vmatprep.subr.bf16.mxu0 %v408_v23  ;;  %902 = vmatprep.subr.bf16.mxu1 %v408_v23 }
  0xd9   :  { %874 = vmatpush3.bf16.msra.mxu0 %v408_v23  ;;  %910 = vmatpush3.bf16.msra.mxu1 %v408_v23  ;;  %v265_v33 = vadd.f32 %v220_v26, %v169_v30 }
  0xda   :  { %753 = vperm.xlu1 %937, %v683_v25  }
  0xdb   :  { %v365_v36 = vadd.f32 %v349_v32, %v265_v33  ;;  %v945_v32 = vld [vmem:[%s1384_s3 + $0x18] sm:$0xff]  }
  0xdc   :  { %v225_v31 = vpop.permute.xlu1 %224  ;;  %v946_v33 = vld [vmem:[%s1384_s3 + $0x38] sm:$0xff]  }
  0xdd   :  { %v266_v37 = vadd.f32 %v225_v31, %v170_v34  ;;  %v381_v40 = vmax.f32 %v365_v36, 0.0  ;;  %v941_v31 = vld [vmem:[%s1384_s3 + $0x8] sm:$0xff]   ;;  %v437_v34 = vpop.permute.xlu0 %436 }
  0xde   :  { %763 = vperm.xlu1 %937, %v685_v29  }
  0xe1   :  { %v311_v35 = vpop.permute.xlu1 %310 }
  0xe2   :  { %v350_v38 = vmul.f32 %v1214_v3, %v311_v35  ;;  %v452_v35 = vpop.permute.xlu0 %451 }
  0xe4   :  { %v366_v39 = vadd.f32 %v350_v38, %v266_v37 }
  0xe6   :  { %v382_v41 = vmax.f32 %v366_v39, 0.0  ;;  %v130_v42 = vpop.permute.xlu1 %129  ;;  %v694_v37 = vpop.permute.xlu0 %693 }
  0xe7   :  { %v171_v47 = vmul.f32 %v1211_v2, %v130_v42 }
  0xe8   :  { %v409_v43 = vpack.c.bf16 %v382_v41, %v381_v40 }
  0xea   :  { %v230_v44 = vpop.permute.xlu1 %229  ;;  %875 = vmatprep.subr.bf16.mxu0 %v409_v43  ;;  %903 = vmatprep.subr.bf16.mxu1 %v409_v43  ;;  %v457_v39 = vpop.permute.xlu0 %456 }
  0xeb   :  { %876 = vmatpush3.bf16.msra.mxu0 %v409_v43  ;;  %911 = vmatpush3.bf16.msra.mxu1 %v409_v43  ;;  %v267_v49 = vadd.f32 %v230_v44, %v171_v47 }
  0xed   :  { %v367_v53 = vadd.f32 %v351_v52, %v267_v49 }
  0xee   :  { %v235_v48 = vpop.permute.xlu1 %234  ;;  %v462_v41 = vpop.permute.xlu0 %461 }
  0xef   :  { %v268_v54 = vadd.f32 %v235_v48, %v172_v50  ;;  %v383_v57 = vmax.f32 %v367_v53, 0.0 }
  0xf2   :  { %v467_v43 = vpop.permute.xlu0 %466 }
  0xf3   :  { %v319_v51 = vpop.permute.xlu1 %318 }
  0xf4   :  { %v352_v55 = vmul.f32 %v1214_v3, %v319_v51 }
  0xf6   :  { %v368_v56 = vadd.f32 %v352_v55, %v268_v54  ;;  %v472_v46 = vpop.permute.xlu0 %471 }
  0xf8   :  { %v384_v59 = vmax.f32 %v368_v56, 0.0  ;;  %v140_v60 = vpop.permute.xlu1 %139 }
  0xf9   :  { %v173_v1 = vmul.f32 %v1211_v2, %v140_v60 }
  0xfa   :  { %v410_v61 = vpack.c.bf16 %v384_v59, %v383_v57  ;;  %v477_v48 = vpop.permute.xlu0 %476 }
  0xfc   :  { %v240_v63 = vpop.permute.xlu1 %239  ;;  %877 = vmatprep.subr.bf16.mxu0 %v410_v61  ;;  %904 = vmatprep.subr.bf16.mxu1 %v410_v61 }
  0xfd   :  { %878 = vmatpush3.bf16.msra.mxu0 %v410_v61  ;;  %912 = vmatpush3.bf16.msra.mxu1 %v410_v61  ;;  %v269_v6 = vadd.f32 %v240_v63, %v173_v1 }
  0xfe   :  { %v482_v49 = vpop.permute.xlu0 %481 }
  0xff   :  { %v369_v10 = vadd.f32 %v353_v58, %v269_v6 }
 0x100   :  { %v245_v4 = vpop.permute.xlu1 %244 }
 0x101   :  { %v270_v11 = vadd.f32 %v245_v4, %v174_v7  ;;  %v385_v14 = vmax.f32 %v369_v10, 0.0 }
 0x102   :  { %v1344_v51 = vpop.permute.xlu0 %486 }
 0x105   :  { %v327_v9 = vpop.permute.xlu1 %326 }
 0x106   :  { %v354_v12 = vmul.f32 %v1214_v3, %v327_v9  ;;  %v1346_v54 = vpop.permute.xlu0 %491 }
 0x108   :  { %v370_v13 = vadd.f32 %v354_v12, %v270_v11 }
 0x10a   :  { %v386_v15 = vmax.f32 %v370_v13, 0.0  ;;  %v150_v16 = vpop.permute.xlu1 %149 }
 0x10b   :  { %v175_v18 = vmul.f32 %v1211_v2, %v150_v16  ;;  %v942_v2 = vld [vmem:[%s1384_s3 + $0x28] sm:$0xff]  }
 0x10c   :  { %v411_v17 = vpack.c.bf16 %v386_v15, %v385_v14 }
 0x10e   :  { %v250_v45 = vpop.permute.xlu1 %249  ;;  %879 = vmatprep.subr.bf16.mxu0 %v411_v17  ;;  %905 = vmatprep.subr.bf16.mxu1 %v411_v17 }
 0x10f   :  { %880 = vmatpush3.bf16.msra.mxu0 %v411_v17  ;;  %913 = vmatpush3.bf16.msra.mxu1 %v411_v17  ;;  %v271_v0 = vadd.f32 %v250_v45, %v175_v18 }
 0x111   :  { %v371_v24 = vadd.f32 %v355_v22, %v271_v0 }
 0x112   :  { %v255_v19 = vpop.permute.xlu1 %254 }
 0x113   :  { %v272_v25 = vadd.f32 %v255_v19, %v176_v21  ;;  %v387_v28 = vmax.f32 %v371_v24, 0.0 }
 0x117   :  { %v335_v23 = vpop.permute.xlu1 %334 }
 0x118   :  { %v356_v26 = vmul.f32 %v1214_v3, %v335_v23  ;;  %v943_v3 = vld [vmem:[%s1384_s3 + $0x10] sm:$0xff]   ;;  %s803_s3 = sld [smem:[#allocation2]] }
 0x11a   :  { %v372_v27 = vadd.f32 %v356_v26, %v272_v25 }
 0x11c   :  { %v388_v29 = vmax.f32 %v372_v27, 0.0  ;;  %v432_v36 = vpop.permute.xlu1 %431 }
 0x11e   :  { %v412_v30 = vpack.c.bf16 %v388_v29, %v387_v28 }
 0x120   :  { %881 = vmatprep.subr.bf16.mxu0 %v412_v30  ;;  %906 = vmatprep.subr.bf16.mxu1 %v412_v30  ;;  %v442_v38 = vpop.permute.xlu1 %441 }
 0x121   :  { %882 = vmatpush3.bf16.msra.mxu0 %v412_v30  ;;  %914 = vmatpush3.bf16.msra.mxu1 %v412_v30 }
 0x124   :  { %884 = vmatmul.mubr.bf16.vlgmr.msra.gmra.mrb[0].mxu0 %v941_v31  ;;  %892 = vmatmul.mubr.bf16.vlgmr.msra.gmra.mrb[0].mxu1 %v942_v2  ;;  %v447_v40 = vpop.permute.xlu1 %446 }
 0x125   :  { %887 = vmatprep.mubr.bf16.mxu0 %v943_v3  ;;  %895 = vmatprep.mubr.bf16.mxu1 %v944_v8 }
 0x128   :  { %v689_v42 = vpop.permute.xlu1 %688 }
 0x12c   :  { %888 = vmatmul.mubr.bf16.gmra.mrb[4].mxu0 %v945_v32  ;;  %896 = vmatmul.mubr.bf16.gmra.mrb[4].mxu1 %v946_v33  ;;  %v699_v44 = vpop.permute.xlu1 %698 }
 0x130   :  { %v704_v47 = vpop.permute.xlu1 %703 }
 0x131   :  { %v1348_v56 = vpop.permute.xlu0 %496 }
 0x134   :  { %v709_v52 = vpop.permute.xlu1 %708 }
 0x135   :  { %v1352_v59 = vpop.permute.xlu0 %501 }
 0x138   :  { %v714_v50 = vpop.permute.xlu1 %713 }
 0x139   :  { %v1356_v61 = vpop.permute.xlu0 %506 }
 0x13c   :  { %v719_v53 = vpop.permute.xlu1 %718 }
 0x13f   :  { %v1358_v45 = vpop.permute.xlu0 %758 }
 0x140   :  { %v724_v55 = vpop.permute.xlu1 %723 }
 0x144   :  { %v1350_v57 = vpop.permute.xlu1 %728 }
 0x148   :  { %v1354_v60 = vpop.permute.xlu1 %733 }
 0x14c   :  { %v739_v17 = vpop.permute.xlu1 %738 }
 0x1f7   :  { %v885_v63 = vpop.f32.mrb[0].mxu0  ;;  %v893_v1 = vpop.f32.mrb[0].mxu1 }
 0x1f8   :  { %v591_v4 = vpop.f32.mrb[1].mxu0  ;;  %v623_v5 = vpop.f32.mrb[1].mxu1  ;;  %v600_v58 = vadd.f32 %v885_v63, %v442_v38 }
 0x1f9   :  { %v592_v6 = vadd.f32 %v591_v4, %v432_v36  ;;  %v886_v7 = vpop.f32.mrb[2].mxu0  ;;  %v894_v9 = vpop.f32.mrb[2].mxu1 }
 0x1fa   :  { %v603_v10 = vadd.f32 %v886_v7, %v447_v40  ;;  %v594_v11 = vpop.f32.mrb[3].mxu0  ;;  %v626_v12 = vpop.f32.mrb[3].mxu1  ;;  %v656_v15 = vmax.f32 %v600_v58, 0.0  ;;  %v632_v58 = vadd.f32 %v893_v1, %v482_v49 }
 0x1fb   :  { %v654_v13 = vmax.f32 %v592_v6, 0.0  ;;  %v595_v14 = vadd.f32 %v594_v11, %v437_v34  ;;  %v624_v34 = vadd.f32 %v623_v5, %v472_v46  ;;  %v627_v63 = vadd.f32 %v626_v12, %v477_v48 }
 0x1fc   :  { %v657_v18 = vmax.f32 %v603_v10, 0.0  ;;  %v768_v24 = vmul.f32 %v699_v44, %v656_v15  ;;  %v664_v5 = vmax.f32 %v632_v58, 0.0 }
 0x1fd   :  { %v655_v16 = vmax.f32 %v595_v14, 0.0  ;;  %v766_v19 = vmul.f32 %v689_v42, %v654_v13  ;;  %v810_v42 = vpop.permute.xlu0 %809  ;;  %v662_v6 = vmax.f32 %v624_v34, 0.0  ;;  %v822_v34 = vstv %s850_s2 }
 0x1fe   :  { %v769_v30 = vmul.f32 %v704_v47, %v657_v18  ;;  %v812_v10 = vmul.f32 %v810_v42, %v1203_v62  ;;  %v776_v62 = vmul.f32 %v739_v17, %v664_v5 }
 0x1ff   :  { %v767_v20 = vmul.f32 %v694_v37, %v655_v16  ;;  %v889_v0 = vpop.f32.mrb[4].mxu0  ;;  %v897_v21 = vpop.f32.mrb[4].mxu1  ;;  %v774_v11 = vmul.f32 %v1350_v57, %v662_v6 }
 0x200   :  { %v607_v22 = vpop.f32.mrb[5].mxu0  ;;  %v639_v23 = vpop.f32.mrb[5].mxu1  ;;  %v616_v26 = vadd.f32 %v889_v0, %v462_v41  ;;  %v814_v13 = vsel %vm813_vm0, %v812_v10, 0.0 }
 0x201   :  { %v782_v25 = vadd.f32 %v767_v20, %v766_v19  ;;  %v608_v27 = vadd.f32 %v607_v22, %v452_v35  ;;  %v890_v28 = vpop.f32.mrb[6].mxu0  ;;  %v898_v29 = vpop.f32.mrb[6].mxu1  ;;  %v640_v48 = vadd.f32 %v639_v23, %v1346_v54  ;;  %v815_v15 = vrot.slane %v814_v13, 4 }
 0x202   :  { %v610_v31 = vpop.f32.mrb[7].mxu0  ;;  %v642_v2 = vpop.f32.mrb[7].mxu1  ;;  %v619_v32 = vadd.f32 %v890_v28, %v467_v43  ;;  %v660_v36 = vmax.f32 %v616_v26, 0.0  ;;  %v663_v43 = vmax.f32 %v627_v63, 0.0  ;;  %v651_v57 = vadd.f32 %v898_v29, %v1356_v61 }
 0x203   :  { %v783_v3 = vadd.f32 %v782_v25, %v768_v24  ;;  %v658_v8 = vmax.f32 %v608_v27, 0.0  ;;  %v611_v33 = vadd.f32 %v610_v31, %v457_v39  ;;  %v744_v35 = vpop.permute.xlu1 %743  ;;  %v635_v39 = vadd.f32 %v894_v9, %v1344_v51 }
 0x204   :  { %v661_v4 = vmax.f32 %v619_v32, 0.0  ;;  %v772_v47 = vmul.f32 %v719_v53, %v660_v36  ;;  %v775_v53 = vmul.f32 %v1354_v60, %v663_v43  ;;  %v643_v14 = vadd.f32 %v642_v2, %v1348_v56 }
 0x205   :  { %v770_v37 = vmul.f32 %v709_v52, %v658_v8  ;;  %v784_v38 = vadd.f32 %v783_v3, %v769_v30  ;;  %v659_v40 = vmax.f32 %v611_v33, 0.0  ;;  %v665_v49 = vmax.f32 %v635_v39, 0.0 }
 0x206   :  { %v773_v46 = vmul.f32 %v724_v55, %v661_v4  ;;  %v648_v51 = vadd.f32 %v897_v21, %v1352_v59  ;;  %v666_v9 = vmax.f32 %v640_v48, 0.0  ;;  %v667_v18 = vmax.f32 %v643_v14, 0.0 }
 0x207   :  { %v785_v44 = vadd.f32 %v784_v38, %v770_v37  ;;  %v771_v41 = vmul.f32 %v714_v50, %v659_v40  ;;  %v749_v50 = vpop.permute.xlu1 %748  ;;  %v777_v16 = vmul.f32 %v744_v35, %v665_v49  ;;  %v816_v23 = vadd.f32 %v815_v15, %v814_v13 }
 0x208   :  { %v668_v20 = vmax.f32 %v648_v51, 0.0  ;;  %v778_v0 = vmul.f32 %v749_v50, %v666_v9  ;;  %v669_v60 = vmax.f32 %v651_v57, 0.0  ;;  %v804_v33 = vstv %s803_s3 }
 0x209   :  { %v786_v7 = vadd.f32 %v785_v44, %v771_v41  ;;  %v817_v21 = vrot.slane %v816_v23, 2 }
 0x20a   :  { %v780_v56 = vmul.f32 %v1358_v45, %v668_v20 }
 0x20b   :  { %v787_v52 = vadd.f32 %v786_v7, %v772_v47  ;;  %v754_v19 = vpop.permute.xlu1 %753  ;;  %v818_v30 = vadd.f32 %v817_v21, %v816_v23 }
 0x20c   :  { %v779_v24 = vmul.f32 %v754_v19, %v667_v18 }
 0x20d   :  { %v788_v12 = vadd.f32 %v787_v52, %v773_v46  ;;  %v819_v31 = vrot.slane %v818_v30, 1 }
 0x20f   :  { %v789_v1 = vadd.f32 %v788_v12, %v774_v11  ;;  %v764_v59 = vpop.permute.xlu1 %763  ;;  %v820_v32 = vadd.f32 %v819_v31, %v818_v30 }
 0x210   :  { %v781_v26 = vmul.f32 %v764_v59, %v669_v60 }
 0x211   :  { %v790_v55 = vadd.f32 %v789_v1, %v775_v53  ;;  %v823_v37 = vadd.f32 %v822_v34, %v820_v32 }
 0x213   :  { %v791_v54 = vadd.f32 %v790_v55, %v776_v62 }
 0x215   :  { %v792_v22 = vadd.f32 %v791_v54, %v777_v16 }
 0x217   :  { %v793_v25 = vadd.f32 %v792_v22, %v778_v0 }
 0x219   :  { %v794_v17 = vadd.f32 %v793_v25, %v779_v24 }
 0x21b   :  { %v795_v27 = vadd.f32 %v794_v17, %v780_v56 }
 0x21d   :  { %v796_v28 = vadd.f32 %v795_v27, %v781_v26 }
 0x21f   :  { %v797_v61 = vrot.slane %v796_v28, 4 }
 0x221   :  { %v798_v29 = vadd.f32 %v797_v61, %v796_v28 }
 0x223   :  { %v799_v2 = vrot.slane %v798_v29, 2 }
 0x225   :  { %v800_v3 = vadd.f32 %v799_v2, %v798_v29 }
 0x227   :  { %v801_v8 = vrot.slane %v800_v3, 1 }
 0x229   :  { %v802_v36 = vadd.f32 %v801_v8, %v800_v3 }
 0x22b   :  { %v805_v45 = vadd.f32 %v804_v33, %v802_v36 }
 0x22d   :  { %v825_v38 = vsel %vm824_vm1, %v805_v45, %v823_v37 }
 0x22e   :  { %826 = vst [vmem:[#allocation5] sm:$0x3] %v825_v38 }
 0x22f   :  { %970 = shalt.err (!%p967_p9)
}
 0x230   :  { %s971_s12 = scalar_lea.hbm %s1389_s8, 32 }
 0x231   :  { %p972_p10 = scmp.ne.s32.totalorder %s1389_s8, %s971_s12  ;;  %p975_p11 = scmp.lt.u32.totalorder %s971_s12, %s1389_s8 }
 0x233   :  { %p977_p12 = pnand %p975_p11, %p972_p10 }
 0x235   :  { %980 = shalt.err (!%p977_p12)
}
 0x236   :  { %836 = dma.vmem_to_hbm [thread:$0]  %s834_s30, 32, %s1389_s8, [#allocation3]  }
 0x237   :  { %983 = dma.done.wait [#allocation3], 32  }
 0x238   :  { %984 = vsyncadd [#allocation3], 4294967264 }
 0x239   :  { %840 = vsyncpa [#allocation3], 1 }
 0x23a   :  { %841 = vsyncpa [#allocation4], 1 }

// kernel: tpu_custom_call.1
= control target key start
LH: loop header
LB: loop body
LE: loop exit
PB: predicated region body
PF: predicated region fallthrough
CT: control target
= control target key end

     0   :  { %13 = vsyncpa [#allocation4], 0  ;;  %s1381_s0 = inlined_call_operand.vmem [shape: f32[2,128], index: 0, kind: input, shape index: {}]   ;;  %s1382_s1 = inlined_call_operand.vmem [shape: f32[128,2], index: 1, kind: input, shape index: {}]   ;;  %s1383_s2 = inlined_call_operand.vmem [shape: f32[128,1], index: 2, kind: input, shape index: {}]   ;;  %s1384_s3 = inlined_call_operand.vmem [shape: bf16[128,128], index: 3, kind: input, shape index: {}]   ;;  %s1385_s4 = inlined_call_operand.vmem [shape: f32[128,1], index: 4, kind: input, shape index: {}]   ;;  %s1386_s5 = inlined_call_operand.vmem [shape: f32[128,1], index: 5, kind: input, shape index: {}]   ;;  %s1387_s6 = inlined_call_operand.vmem [shape: f32[2,1], index: 6, kind: input, shape index: {}]   ;;  %s1388_s7 = inlined_call_operand.vmem [shape: f32[2], index: 7, kind: input, shape index: {}]   ;;  %s1389_s8 = inlined_call_operand.hbm [shape: f32[2,128], index: 8, kind: output, shape index: {}]  }
   0x1   :  { %14 = vsyncpa [#allocation3], 0  ;;  %s35_s29 = sshll.u32 %s1388_s7, 4  ;;  %s36_s29 = int_to_ptr.vmem [resolvable:$true] %s35_s29 }
   0x2   :  { %s947_s30 = scalar_lea.vmem %s36_s29, 16  ;;  %p952_p1 = scmp.lt.s32.totalorder %s36_s29, %s36_s29 }
   0x3   :  { %p948_p0 = scmp.ne.s32.totalorder %s36_s29, %s947_s30  ;;  %p953_p2 = scmp.lt.s32.totalorder %s947_s30, %s947_s30 }
   0x5   :  { %p954_p3 = por %p953_p2, %p952_p1 }
   0x7   :  { %p955_p4 = pnand %p954_p3, %p948_p0 }
   0x9   :  { %958 = shalt.err (!%p955_p4)
}
   0xa   :  { %s985_s9 = smov [#allocation2]  }
   0xb   :  { %38 = dma.vmem_to_smem %s36_s29, 16, %s985_s9, [#allocation4]  }
   0xc   :  { %981 = dma.done.wait [#allocation4], 16  }
   0xd   :  { %982 = vsyncadd [#allocation4], 4294967280 }
   0xe   :  { %42 = sfence }
   0xf   :  { %v61_v0 = vld [vmem:[%s1382_s1] sm:$0xff]  ;;  %v986_v2 = vmov 0   ;;  %v62_v3 = vld [vmem:[%s1382_s1 + $0x8] sm:$0xff]  ;;  %v64_v5 = vld [vmem:[%s1382_s1 + $0x18] sm:$0xff]  ;;  %v987_v6 = vmov 1   ;;  %v157_v49 = vlaneseq  ;;  %vm813_vm0 = vcmask 1041408  }
  0x10   :  { %v45_v1 = vld [vmem:[%s1383_s2] sm:$0xff]  ;;  %920 = vset.pattern.permute.xlu1 %v986_v2  ;;  %919 = vset.pattern.permute.xlu0 %v986_v2  ;;  %v46_v4 = vld [vmem:[%s1383_s2 + $0x8] sm:$0xff]  ;;  %v63_v8 = vld [vmem:[%s1382_s1 + $0x10] sm:$0xff]  ;;  %s988_s29 = smov [#allocation5]   ;;  %vm824_vm1 = vcmask 1040384  }
  0x11   :  { %79 = vperm.xlu0 %919, %v61_v0   ;;  %179 = vperm.xlu1 %920, %v45_v1   ;;  %v66_v7 = vld [vmem:[%s1382_s1 + $0x28] sm:$0xff]  ;;  %v68_v9 = vld [vmem:[%s1382_s1 + $0x38] sm:$0xff]  ;;  %v47_v10 = vld [vmem:[%s1383_s2 + $0x10] sm:$0xff]  ;;  %v158_v54 = vshrl.u32 %v157_v49, 7  ;;  %s833_s30 = sshll.u32 %s988_s29, 4  ;;  %s834_s30 = int_to_ptr.vmem [resolvable:$true] %s833_s30 }
  0x12   :  { %v70_v11 = vld [vmem:[%s1382_s1 + $0x48] sm:$0xff]  ;;  %v48_v12 = vld [vmem:[%s1383_s2 + $0x18] sm:$0xff]  ;;  %v65_v16 = vld [vmem:[%s1382_s1 + $0x20] sm:$0xff]  ;;  %s959_s9 = scalar_lea.vmem %s834_s30, 32  ;;  %p964_p6 = scmp.lt.s32.totalorder %s834_s30, %s834_s30 }
  0x13   :  { %v72_v13 = vld [vmem:[%s1382_s1 + $0x58] sm:$0xff]  ;;  %v74_v14 = vld [vmem:[%s1382_s1 + $0x68] sm:$0xff]  ;;  %v49_v17 = vld [vmem:[%s1383_s2 + $0x20] sm:$0xff]  ;;  %v159_v59 = vsub.s32 0, %v158_v54  ;;  %v339_v60 = vsub.s32 1, %v158_v54  ;;  %p960_p5 = scmp.ne.s32.totalorder %s834_s30, %s959_s9  ;;  %p965_p7 = scmp.lt.s32.totalorder %s959_s9, %s959_s9 }
  0x14   :  { %v1084_v15 = vld [vmem:[%s1382_s1 + $0x78] sm:$0xff]  ;;  %v50_v18 = vld [vmem:[%s1383_s2 + $0x28] sm:$0xff]  ;;  %v67_v19 = vld [vmem:[%s1382_s1 + $0x30] sm:$0xff] }
  0x15   :  { %84 = vperm.xlu0 %919, %v62_v3   ;;  %184 = vperm.xlu1 %920, %v46_v4   ;;  %v51_v20 = vld [vmem:[%s1383_s2 + $0x30] sm:$0xff]  ;;  %v69_v21 = vld [vmem:[%s1382_s1 + $0x40] sm:$0xff]  ;;  %v52_v22 = vld [vmem:[%s1383_s2 + $0x38] sm:$0xff]  ;;  %p966_p8 = por %p965_p7, %p964_p6 }
  0x16   :  { %v71_v23 = vld [vmem:[%s1382_s1 + $0x50] sm:$0xff]  ;;  %v73_v24 = vld [vmem:[%s1382_s1 + $0x60] sm:$0xff]  ;;  %v54_v27 = vld [vmem:[%s1383_s2 + $0x48] sm:$0xff] }
  0x17   :  { %v75_v25 = vld [vmem:[%s1382_s1 + $0x70] sm:$0xff]  ;;  %v53_v26 = vld [vmem:[%s1383_s2 + $0x40] sm:$0xff]  ;;  %v56_v29 = vld [vmem:[%s1383_s2 + $0x58] sm:$0xff]  ;;  %p967_p9 = pnand %p966_p8, %p960_p5 }
  0x18   :  { %v55_v28 = vld [vmem:[%s1383_s2 + $0x50] sm:$0xff]  ;;  %v57_v30 = vld [vmem:[%s1383_s2 + $0x60] sm:$0xff]  ;;  %v58_v31 = vld [vmem:[%s1383_s2 + $0x68] sm:$0xff] }
  0x19   :  { %94 = vperm.xlu0 %919, %v64_v5   ;;  %921 = vset.pattern.permute.xlu1 %v987_v6  ;;  %v59_v32 = vld [vmem:[%s1383_s2 + $0x70] sm:$0xff]  ;;  %v60_v35 = vld [vmem:[%s1383_s2 + $0x78] sm:$0xff]  ;;  %v413_v40 = vld [vmem:[%s1385_s4] sm:$0xff]  ;;  %s850_s2 = sld [smem:[#allocation2 + $0x1]] }
  0x1a   :  { %278 = vperm.xlu1 %921, %v62_v3   ;;  %v414_v42 = vld [vmem:[%s1385_s4 + $0x8] sm:$0xff]  ;;  %v415_v44 = vld [vmem:[%s1385_s4 + $0x10] sm:$0xff]  ;;  %v417_v46 = vld [vmem:[%s1385_s4 + $0x20] sm:$0xff] }
  0x1b   :  { %v939_v47 = vld [vmem:[%s1384_s3] sm:$0xff]   ;;  %v416_v51 = vld [vmem:[%s1385_s4 + $0x18] sm:$0xff]  ;;  %v671_v53 = vld [vmem:[%s1386_s5 + $0x8] sm:$0xff] }
  0x1c   :  { %v940_v48 = vld [vmem:[%s1384_s3 + $0x20] sm:$0xff]   ;;  %883 = vmatprep.mubr.bf16.mxu0 %v939_v47  ;;  %v418_v57 = vld [vmem:[%s1385_s4 + $0x28] sm:$0xff]  ;;  %v672_v61 = vld [vmem:[%s1386_s5 + $0x10] sm:$0xff] }
  0x1d   :  { %104 = vperm.xlu0 %919, %v66_v7   ;;  %891 = vmatprep.mubr.bf16.mxu1 %v940_v48  ;;  %v670_v56 = vld [vmem:[%s1386_s5] sm:$0xff]  ;;  %v419_v1 = vld [vmem:[%s1385_s4 + $0x30] sm:$0xff]  ;;  %v673_v4 = vld [vmem:[%s1386_s5 + $0x18] sm:$0xff] }
  0x1e   :  { %922 = vset.pattern.permute.xlu1 %v986_v2  ;;  %v1203_v62 = vld [vmem:[%s1381_s0] sm:$0x3]  ;;  %v677_v48 = vld [vmem:[%s1386_s5 + $0x38] sm:$0xff] }
  0x1f   :  { %89 = vperm.xlu1 %922, %v63_v8   ;;  %v1214_v3 = vrot.slane %v1203_v62, %v339_v60  ;;  %v425_v60 = vld [vmem:[%s1385_s4 + $0x60] sm:$0xff] }
  0x21   :  { %114 = vperm.xlu0 %919, %v68_v9  }
  0x23   :  { %189 = vperm.xlu1 %922, %v47_v10  }
  0x25   :  { %124 = vperm.xlu0 %919, %v70_v11  }
  0x27   :  { %194 = vperm.xlu1 %922, %v48_v12  }
  0x29   :  { %134 = vperm.xlu0 %919, %v72_v13  }
  0x2b   :  { %923 = vset.pattern.permute.xlu1 %v987_v6 }
  0x2c   :  { %286 = vperm.xlu1 %923, %v64_v5   ;;  %v420_v5 = vld [vmem:[%s1385_s4 + $0x38] sm:$0xff] }
  0x2d   :  { %144 = vperm.xlu0 %919, %v74_v14  }
  0x30   :  { %924 = vset.pattern.permute.xlu1 %v986_v2 }
  0x31   :  { %154 = vperm.xlu0 %919, %v1084_v15   ;;  %99 = vperm.xlu1 %924, %v65_v16  }
  0x35   :  { %935 = vset.pattern.permute.xlu0 %v987_v6  ;;  %199 = vperm.xlu1 %924, %v49_v17  }
  0x36   :  { %274 = vperm.xlu0 %935, %v61_v0  }
  0x39   :  { %204 = vperm.xlu1 %924, %v50_v18  }
  0x3a   :  { %282 = vperm.xlu0 %935, %v63_v8  }
  0x3d   :  { %925 = vset.pattern.permute.xlu1 %v987_v6 }
  0x3e   :  { %290 = vperm.xlu0 %935, %v65_v16   ;;  %294 = vperm.xlu1 %925, %v66_v7  }
  0x42   :  { %926 = vset.pattern.permute.xlu1 %v986_v2  ;;  %298 = vperm.xlu0 %935, %v67_v19  }
  0x43   :  { %109 = vperm.xlu1 %926, %v67_v19  }
  0x46   :  { %306 = vperm.xlu0 %935, %v69_v21  }
  0x47   :  { %209 = vperm.xlu1 %926, %v51_v20  }
  0x4a   :  { %314 = vperm.xlu0 %935, %v71_v23  }
  0x4b   :  { %214 = vperm.xlu1 %926, %v52_v22  }
  0x4e   :  { %322 = vperm.xlu0 %935, %v73_v24  }
  0x4f   :  { %927 = vset.pattern.permute.xlu1 %v987_v6 }
  0x50   :  { %302 = vperm.xlu1 %927, %v68_v9  }
  0x52   :  { %330 = vperm.xlu0 %935, %v75_v25  }
  0x54   :  { %928 = vset.pattern.permute.xlu1 %v986_v2 }
  0x55   :  { %119 = vperm.xlu1 %928, %v69_v21   ;;  %v675_v21 = vld [vmem:[%s1386_s5 + $0x28] sm:$0xff] }
  0x56   :  { %938 = vset.pattern.permute.xlu0 %v986_v2 }
  0x57   :  { %436 = vperm.xlu0 %938, %v414_v42   ;;  %v423_v42 = vld [vmem:[%s1385_s4 + $0x50] sm:$0xff] }
  0x59   :  { %219 = vperm.xlu1 %928, %v53_v26  }
  0x5b   :  { %451 = vperm.xlu0 %938, %v417_v46  }
  0x5d   :  { %224 = vperm.xlu1 %928, %v54_v27  }
  0x5f   :  { %693 = vperm.xlu0 %938, %v671_v53   ;;  %v424_v53 = vld [vmem:[%s1385_s4 + $0x58] sm:$0xff] }
  0x61   :  { %929 = vset.pattern.permute.xlu1 %v987_v6 }
  0x62   :  { %310 = vperm.xlu1 %929, %v70_v11   ;;  %v674_v11 = vld [vmem:[%s1386_s5 + $0x20] sm:$0xff] }
  0x63   :  { %456 = vperm.xlu0 %938, %v418_v57   ;;  %v678_v57 = vld [vmem:[%s1386_s5 + $0x40] sm:$0xff] }
  0x66   :  { %930 = vset.pattern.permute.xlu1 %v986_v2 }
  0x67   :  { %129 = vperm.xlu1 %930, %v71_v23   ;;  %461 = vperm.xlu0 %938, %v419_v1   ;;  %v422_v23 = vld [vmem:[%s1385_s4 + $0x48] sm:$0xff] }
  0x6b   :  { %229 = vperm.xlu1 %930, %v55_v28   ;;  %466 = vperm.xlu0 %938, %v420_v5  }
  0x6f   :  { %234 = vperm.xlu1 %930, %v56_v29  }
  0x73   :  { %931 = vset.pattern.permute.xlu1 %v987_v6 }
  0x74   :  { %318 = vperm.xlu1 %931, %v72_v13   ;;  %v421_v13 = vld [vmem:[%s1385_s4 + $0x40] sm:$0xff] }
  0x75   :  { %471 = vperm.xlu0 %938, %v421_v13   ;;  %v681_v13 = vld [vmem:[%s1386_s5 + $0x58] sm:$0xff] }
  0x78   :  { %932 = vset.pattern.permute.xlu1 %v986_v2 }
  0x79   :  { %139 = vperm.xlu1 %932, %v73_v24   ;;  %476 = vperm.xlu0 %938, %v422_v23  }
  0x7d   :  { %239 = vperm.xlu1 %932, %v57_v30   ;;  %481 = vperm.xlu0 %938, %v423_v42  }
  0x81   :  { %244 = vperm.xlu1 %932, %v58_v31   ;;  %486 = vperm.xlu0 %938, %v424_v53  }
  0x85   :  { %933 = vset.pattern.permute.xlu1 %v987_v6  ;;  %491 = vperm.xlu0 %938, %v425_v60  }
  0x86   :  { %326 = vperm.xlu1 %933, %v74_v14  }
  0x8a   :  { %934 = vset.pattern.permute.xlu1 %v986_v2 }
  0x8b   :  { %149 = vperm.xlu1 %934, %v75_v25  }
  0x8f   :  { %249 = vperm.xlu1 %934, %v59_v32  }
  0x90   :  { %v80_v33 = vpop.permute.xlu0 %79  ;;  %v1151_v34 = vpop.permute.xlu1 %179 }
  0x93   :  { %254 = vperm.xlu1 %934, %v60_v35  }
  0x94   :  { %v85_v36 = vpop.permute.xlu0 %84  ;;  %v185_v37 = vpop.permute.xlu1 %184 }
  0x97   :  { %936 = vset.pattern.permute.xlu1 %v987_v6 }
  0x98   :  { %334 = vperm.xlu1 %936, %v1084_v15   ;;  %v95_v38 = vpop.permute.xlu0 %94 }
  0x99   :  { %v279_v39 = vpop.permute.xlu1 %278 }
  0x9a   :  { %v342_v10 = vmul.f32 %v1214_v3, %v279_v39 }
  0x9c   :  { %v1161_v41 = vpop.permute.xlu0 %104  ;;  %937 = vset.pattern.permute.xlu1 %v986_v2  ;;  %v1211_v2 = vrot.slane %v1203_v62, %v159_v59 }
  0x9d   :  { %431 = vperm.xlu1 %937, %v413_v40  }
  0x9e   :  { %v90_v43 = vpop.permute.xlu1 %89  ;;  %v162_v6 = vmul.f32 %v1211_v2, %v85_v36  ;;  %v161_v9 = vmul.f32 %v1211_v2, %v80_v33  ;;  %v164_v12 = vmul.f32 %v1211_v2, %v95_v38  ;;  %v166_v27 = vmul.f32 %v1211_v2, %v1161_v41 }
  0x9f   :  { %v163_v24 = vmul.f32 %v1211_v2, %v90_v43 }
  0xa0   :  { %v1170_v45 = vpop.permute.xlu0 %114  ;;  %v258_v14 = vadd.f32 %v185_v37, %v162_v6  ;;  %v257_v18 = vadd.f32 %v1151_v34, %v161_v9  ;;  %v676_v34 = vld [vmem:[%s1386_s5 + $0x30] sm:$0xff] }
  0xa1   :  { %441 = vperm.xlu1 %937, %v415_v44   ;;  %v168_v9 = vmul.f32 %v1211_v2, %v1170_v45  ;;  %v428_v45 = vld [vmem:[%s1385_s4 + $0x78] sm:$0xff] }
  0xa2   :  { %v190_v50 = vpop.permute.xlu1 %189  ;;  %v358_v19 = vadd.f32 %v342_v10, %v258_v14 }
  0xa3   :  { %v259_v31 = vadd.f32 %v190_v50, %v163_v24  ;;  %v684_v24 = vld [vmem:[%s1386_s5 + $0x70] sm:$0xff] }
  0xa4   :  { %v1184_v52 = vpop.permute.xlu0 %124  ;;  %v374_v30 = vmax.f32 %v358_v19, 0.0  ;;  %v682_v19 = vld [vmem:[%s1386_s5 + $0x60] sm:$0xff] }
  0xa5   :  { %446 = vperm.xlu1 %937, %v416_v51  }
  0xa6   :  { %v195_v55 = vpop.permute.xlu1 %194 }
  0xa7   :  { %v260_v22 = vadd.f32 %v195_v55, %v164_v12  ;;  %v427_v12 = vld [vmem:[%s1385_s4 + $0x70] sm:$0xff] }
  0xa8   :  { %v1195_v58 = vpop.permute.xlu0 %134 }
  0xa9   :  { %688 = vperm.xlu1 %937, %v670_v56  }
  0xab   :  { %v287_v63 = vpop.permute.xlu1 %286 }
  0xac   :  { %v1205_v0 = vpop.permute.xlu0 %144  ;;  %v344_v16 = vmul.f32 %v1214_v3, %v287_v63  ;;  %v679_v63 = vld [vmem:[%s1386_s5 + $0x48] sm:$0xff] }
  0xad   :  { %698 = vperm.xlu1 %937, %v672_v61  }
  0xae   :  { %v360_v28 = vadd.f32 %v344_v16, %v260_v22 }
  0xb0   :  { %v100_v7 = vpop.permute.xlu1 %99  ;;  %v1223_v8 = vpop.permute.xlu0 %154  ;;  %v376_v38 = vmax.f32 %v360_v28, 0.0  ;;  %v806_v28 = vld [vmem:[%s1387_s6] sm:$0x3] }
  0xb1   :  { %703 = vperm.xlu1 %937, %v673_v4   ;;  %v165_v35 = vmul.f32 %v1211_v2, %v100_v7  ;;  %v426_v4 = vld [vmem:[%s1385_s4 + $0x68] sm:$0xff]  ;;  %v680_v7 = vld [vmem:[%s1386_s5 + $0x50] sm:$0xff] }
  0xb2   :  { %496 = vperm.xlu0 %938, %v426_v4  }
  0xb4   :  { %v200_v15 = vpop.permute.xlu1 %199 }
  0xb5   :  { %v275_v17 = vpop.permute.xlu0 %274  ;;  %708 = vperm.xlu1 %937, %v674_v11   ;;  %v261_v39 = vadd.f32 %v200_v15, %v165_v35 }
  0xb6   :  { %v341_v20 = vmul.f32 %v1214_v3, %v275_v17  ;;  %501 = vperm.xlu0 %938, %v427_v12  }
  0xb8   :  { %v357_v25 = vadd.f32 %v341_v20, %v257_v18  ;;  %v205_v26 = vpop.permute.xlu1 %204 }
  0xb9   :  { %v283_v29 = vpop.permute.xlu0 %282  ;;  %713 = vperm.xlu1 %937, %v675_v21   ;;  %v262_v43 = vadd.f32 %v205_v26, %v166_v27 }
  0xba   :  { %v373_v32 = vmax.f32 %v357_v25, 0.0  ;;  %v343_v33 = vmul.f32 %v1214_v3, %v283_v29  ;;  %506 = vperm.xlu0 %938, %v428_v45   ;;  %v683_v25 = vld [vmem:[%s1386_s5 + $0x68] sm:$0xff]  ;;  %v685_v29 = vld [vmem:[%s1386_s5 + $0x78] sm:$0xff] }
  0xbc   :  { %v405_v36 = vpack.c.bf16 %v374_v30, %v373_v32  ;;  %v359_v37 = vadd.f32 %v343_v33, %v259_v31 }
  0xbd   :  { %v291_v40 = vpop.permute.xlu0 %290  ;;  %v295_v41 = vpop.permute.xlu1 %294  ;;  %718 = vperm.xlu1 %937, %v676_v34   ;;  %v170_v34 = vmul.f32 %v1211_v2, %v1184_v52 }
  0xbe   :  { %v375_v44 = vmax.f32 %v359_v37, 0.0  ;;  %v345_v46 = vmul.f32 %v1214_v3, %v291_v40  ;;  %v346_v47 = vmul.f32 %v1214_v3, %v295_v41  ;;  %867 = vmatprep.subr.bf16.mxu0 %v405_v36  ;;  %899 = vmatprep.subr.bf16.mxu1 %v405_v36 }
  0xbf   :  { %868 = vmatpush3.bf16.msra.mxu0 %v405_v36  ;;  %907 = vmatpush3.bf16.msra.mxu1 %v405_v36 }
  0xc0   :  { %v406_v49 = vpack.c.bf16 %v376_v38, %v375_v44  ;;  %v361_v50 = vadd.f32 %v345_v46, %v261_v39  ;;  %v362_v51 = vadd.f32 %v346_v47, %v262_v43  ;;  %758 = vperm.xlu0 %938, %v684_v24  }
  0xc1   :  { %723 = vperm.xlu1 %937, %v677_v48   ;;  %v299_v1 = vpop.permute.xlu0 %298 }
  0xc2   :  { %v377_v54 = vmax.f32 %v361_v50, 0.0  ;;  %v378_v55 = vmax.f32 %v362_v51, 0.0  ;;  %v110_v56 = vpop.permute.xlu1 %109  ;;  %869 = vmatprep.subr.bf16.mxu0 %v406_v49  ;;  %900 = vmatprep.subr.bf16.mxu1 %v406_v49  ;;  %v347_v10 = vmul.f32 %v1214_v3, %v299_v1  ;;  %v172_v50 = vmul.f32 %v1211_v2, %v1195_v58 }
  0xc3   :  { %870 = vmatpush3.bf16.msra.mxu0 %v406_v49  ;;  %908 = vmatpush3.bf16.msra.mxu1 %v406_v49  ;;  %v167_v5 = vmul.f32 %v1211_v2, %v110_v56 }
  0xc4   :  { %v407_v59 = vpack.c.bf16 %v378_v55, %v377_v54  ;;  %809 = vperm.xlu0 %938, %v806_v28  }
  0xc5   :  { %728 = vperm.xlu1 %937, %v678_v57   ;;  %v307_v27 = vpop.permute.xlu0 %306 }
  0xc6   :  { %v210_v61 = vpop.permute.xlu1 %209  ;;  %871 = vmatprep.subr.bf16.mxu0 %v407_v59  ;;  %901 = vmatprep.subr.bf16.mxu1 %v407_v59  ;;  %v349_v32 = vmul.f32 %v1214_v3, %v307_v27 }
  0xc7   :  { %872 = vmatpush3.bf16.msra.mxu0 %v407_v59  ;;  %909 = vmatpush3.bf16.msra.mxu1 %v407_v59  ;;  %v263_v11 = vadd.f32 %v210_v61, %v167_v5 }
  0xc9   :  { %733 = vperm.xlu1 %937, %v679_v63   ;;  %v363_v15 = vadd.f32 %v347_v10, %v263_v11  ;;  %v315_v46 = vpop.permute.xlu0 %314 }
  0xca   :  { %v215_v6 = vpop.permute.xlu1 %214  ;;  %v351_v52 = vmul.f32 %v1214_v3, %v315_v46 }
  0xcb   :  { %v264_v16 = vadd.f32 %v215_v6, %v168_v9  ;;  %v379_v20 = vmax.f32 %v363_v15, 0.0 }
  0xcd   :  { %738 = vperm.xlu1 %937, %v680_v7   ;;  %v323_v5 = vpop.permute.xlu0 %322  ;;  %v174_v7 = vmul.f32 %v1211_v2, %v1205_v0 }
  0xce   :  { %v353_v58 = vmul.f32 %v1214_v3, %v323_v5 }
  0xcf   :  { %v303_v14 = vpop.permute.xlu1 %302 }
  0xd0   :  { %v348_v17 = vmul.f32 %v1214_v3, %v303_v14 }
  0xd1   :  { %743 = vperm.xlu1 %937, %v681_v13  }
  0xd2   :  { %v364_v18 = vadd.f32 %v348_v17, %v264_v16 }
  0xd4   :  { %v380_v21 = vmax.f32 %v364_v18, 0.0  ;;  %v120_v22 = vpop.permute.xlu1 %119 }
  0xd5   :  { %748 = vperm.xlu1 %937, %v682_v19   ;;  %v169_v30 = vmul.f32 %v1211_v2, %v120_v22 }
  0xd6   :  { %v408_v23 = vpack.c.bf16 %v380_v21, %v379_v20  ;;  %v331_v20 = vpop.permute.xlu0 %330  ;;  %v176_v21 = vmul.f32 %v1211_v2, %v1223_v8  ;;  %v944_v8 = vld [vmem:[%s1384_s3 + $0x30] sm:$0xff]  }
  0xd7   :  { %v355_v22 = vmul.f32 %v1214_v3, %v331_v20 }
  0xd8   :  { %v220_v26 = vpop.permute.xlu1 %219  ;;  %873 = vmatprep.subr.bf16.mxu0 %v408_v23  ;;  %902 = vmatprep.subr.bf16.mxu1 %v408_v23 }
  0xd9   :  { %874 = vmatpush3.bf16.msra.mxu0 %v408_v23  ;;  %910 = vmatpush3.bf16.msra.mxu1 %v408_v23  ;;  %v265_v33 = vadd.f32 %v220_v26, %v169_v30 }
  0xda   :  { %753 = vperm.xlu1 %937, %v683_v25  }
  0xdb   :  { %v365_v36 = vadd.f32 %v349_v32, %v265_v33  ;;  %v945_v32 = vld [vmem:[%s1384_s3 + $0x18] sm:$0xff]  }
  0xdc   :  { %v225_v31 = vpop.permute.xlu1 %224  ;;  %v946_v33 = vld [vmem:[%s1384_s3 + $0x38] sm:$0xff]  }
  0xdd   :  { %v266_v37 = vadd.f32 %v225_v31, %v170_v34  ;;  %v381_v40 = vmax.f32 %v365_v36, 0.0  ;;  %v941_v31 = vld [vmem:[%s1384_s3 + $0x8] sm:$0xff]   ;;  %v437_v34 = vpop.permute.xlu0 %436 }
  0xde   :  { %763 = vperm.xlu1 %937, %v685_v29  }
  0xe1   :  { %v311_v35 = vpop.permute.xlu1 %310 }
  0xe2   :  { %v350_v38 = vmul.f32 %v1214_v3, %v311_v35  ;;  %v452_v35 = vpop.permute.xlu0 %451 }
  0xe4   :  { %v366_v39 = vadd.f32 %v350_v38, %v266_v37 }
  0xe6   :  { %v382_v41 = vmax.f32 %v366_v39, 0.0  ;;  %v130_v42 = vpop.permute.xlu1 %129  ;;  %v694_v37 = vpop.permute.xlu0 %693 }
  0xe7   :  { %v171_v47 = vmul.f32 %v1211_v2, %v130_v42 }
  0xe8   :  { %v409_v43 = vpack.c.bf16 %v382_v41, %v381_v40 }
  0xea   :  { %v230_v44 = vpop.permute.xlu1 %229  ;;  %875 = vmatprep.subr.bf16.mxu0 %v409_v43  ;;  %903 = vmatprep.subr.bf16.mxu1 %v409_v43  ;;  %v457_v39 = vpop.permute.xlu0 %456 }
  0xeb   :  { %876 = vmatpush3.bf16.msra.mxu0 %v409_v43  ;;  %911 = vmatpush3.bf16.msra.mxu1 %v409_v43  ;;  %v267_v49 = vadd.f32 %v230_v44, %v171_v47 }
  0xed   :  { %v367_v53 = vadd.f32 %v351_v52, %v267_v49 }
  0xee   :  { %v235_v48 = vpop.permute.xlu1 %234  ;;  %v462_v41 = vpop.permute.xlu0 %461 }
  0xef   :  { %v268_v54 = vadd.f32 %v235_v48, %v172_v50  ;;  %v383_v57 = vmax.f32 %v367_v53, 0.0 }
  0xf2   :  { %v467_v43 = vpop.permute.xlu0 %466 }
  0xf3   :  { %v319_v51 = vpop.permute.xlu1 %318 }
  0xf4   :  { %v352_v55 = vmul.f32 %v1214_v3, %v319_v51 }
  0xf6   :  { %v368_v56 = vadd.f32 %v352_v55, %v268_v54  ;;  %v472_v46 = vpop.permute.xlu0 %471 }
  0xf8   :  { %v384_v59 = vmax.f32 %v368_v56, 0.0  ;;  %v140_v60 = vpop.permute.xlu1 %139 }
  0xf9   :  { %v173_v1 = vmul.f32 %v1211_v2, %v140_v60 }
  0xfa   :  { %v410_v61 = vpack.c.bf16 %v384_v59, %v383_v57  ;;  %v477_v48 = vpop.permute.xlu0 %476 }
  0xfc   :  { %v240_v63 = vpop.permute.xlu1 %239  ;;  %877 = vmatprep.subr.bf16.mxu0 %v410_v61  ;;  %904 = vmatprep.subr.bf16.mxu1 %v410_v61 }
  0xfd   :  { %878 = vmatpush3.bf16.msra.mxu0 %v410_v61  ;;  %912 = vmatpush3.bf16.msra.mxu1 %v410_v61  ;;  %v269_v6 = vadd.f32 %v240_v63, %v173_v1 }
  0xfe   :  { %v482_v49 = vpop.permute.xlu0 %481 }
  0xff   :  { %v369_v10 = vadd.f32 %v353_v58, %v269_v6 }
 0x100   :  { %v245_v4 = vpop.permute.xlu1 %244 }
 0x101   :  { %v270_v11 = vadd.f32 %v245_v4, %v174_v7  ;;  %v385_v14 = vmax.f32 %v369_v10, 0.0 }
 0x102   :  { %v1344_v51 = vpop.permute.xlu0 %486 }
 0x105   :  { %v327_v9 = vpop.permute.xlu1 %326 }
 0x106   :  { %v354_v12 = vmul.f32 %v1214_v3, %v327_v9  ;;  %v1346_v54 = vpop.permute.xlu0 %491 }
 0x108   :  { %v370_v13 = vadd.f32 %v354_v12, %v270_v11 }
 0x10a   :  { %v386_v15 = vmax.f32 %v370_v13, 0.0  ;;  %v150_v16 = vpop.permute.xlu1 %149 }
 0x10b   :  { %v175_v18 = vmul.f32 %v1211_v2, %v150_v16  ;;  %v942_v2 = vld [vmem:[%s1384_s3 + $0x28] sm:$0xff]  }
 0x10c   :  { %v411_v17 = vpack.c.bf16 %v386_v15, %v385_v14 }
 0x10e   :  { %v250_v45 = vpop.permute.xlu1 %249  ;;  %879 = vmatprep.subr.bf16.mxu0 %v411_v17  ;;  %905 = vmatprep.subr.bf16.mxu1 %v411_v17 }
 0x10f   :  { %880 = vmatpush3.bf16.msra.mxu0 %v411_v17  ;;  %913 = vmatpush3.bf16.msra.mxu1 %v411_v17  ;;  %v271_v0 = vadd.f32 %v250_v45, %v175_v18 }
 0x111   :  { %v371_v24 = vadd.f32 %v355_v22, %v271_v0 }
 0x112   :  { %v255_v19 = vpop.permute.xlu1 %254 }
 0x113   :  { %v272_v25 = vadd.f32 %v255_v19, %v176_v21  ;;  %v387_v28 = vmax.f32 %v371_v24, 0.0 }
 0x117   :  { %v335_v23 = vpop.permute.xlu1 %334 }
 0x118   :  { %v356_v26 = vmul.f32 %v1214_v3, %v335_v23  ;;  %v943_v3 = vld [vmem:[%s1384_s3 + $0x10] sm:$0xff]   ;;  %s803_s3 = sld [smem:[#allocation2]] }
 0x11a   :  { %v372_v27 = vadd.f32 %v356_v26, %v272_v25 }
 0x11c   :  { %v388_v29 = vmax.f32 %v372_v27, 0.0  ;;  %v432_v36 = vpop.permute.xlu1 %431 }
 0x11e   :  { %v412_v30 = vpack.c.bf16 %v388_v29, %v387_v28 }
 0x120   :  { %881 = vmatprep.subr.bf16.mxu0 %v412_v30  ;;  %906 = vmatprep.subr.bf16.mxu1 %v412_v30  ;;  %v442_v38 = vpop.permute.xlu1 %441 }
 0x121   :  { %882 = vmatpush3.bf16.msra.mxu0 %v412_v30  ;;  %914 = vmatpush3.bf16.msra.mxu1 %v412_v30 }
 0x124   :  { %884 = vmatmul.mubr.bf16.vlgmr.msra.gmra.mrb[0].mxu0 %v941_v31  ;;  %892 = vmatmul.mubr.bf16.vlgmr.msra.gmra.mrb[0].mxu1 %v942_v2  ;;  %v447_v40 = vpop.permute.xlu1 %446 }
 0x125   :  { %887 = vmatprep.mubr.bf16.mxu0 %v943_v3  ;;  %895 = vmatprep.mubr.bf16.mxu1 %v944_v8 }
 0x128   :  { %v689_v42 = vpop.permute.xlu1 %688 }
 0x12c   :  { %888 = vmatmul.mubr.bf16.gmra.mrb[4].mxu0 %v945_v32  ;;  %896 = vmatmul.mubr.bf16.gmra.mrb[4].mxu1 %v946_v33  ;;  %v699_v44 = vpop.permute.xlu1 %698 }
 0x130   :  { %v704_v47 = vpop.permute.xlu1 %703 }
 0x131   :  { %v1348_v56 = vpop.permute.xlu0 %496 }
 0x134   :  { %v709_v52 = vpop.permute.xlu1 %708 }
 0x135   :  { %v1352_v59 = vpop.permute.xlu0 %501 }
 0x138   :  { %v714_v50 = vpop.permute.xlu1 %713 }
 0x139   :  { %v1356_v61 = vpop.permute.xlu0 %506 }
 0x13c   :  { %v719_v53 = vpop.permute.xlu1 %718 }
 0x13f   :  { %v1358_v45 = vpop.permute.xlu0 %758 }
 0x140   :  { %v724_v55 = vpop.permute.xlu1 %723 }
 0x144   :  { %v1350_v57 = vpop.permute.xlu1 %728 }
 0x148   :  { %v1354_v60 = vpop.permute.xlu1 %733 }
 0x14c   :  { %v739_v17 = vpop.permute.xlu1 %738 }
 0x1f7   :  { %v885_v63 = vpop.f32.mrb[0].mxu0  ;;  %v893_v1 = vpop.f32.mrb[0].mxu1 }
 0x1f8   :  { %v591_v4 = vpop.f32.mrb[1].mxu0  ;;  %v623_v5 = vpop.f32.mrb[1].mxu1  ;;  %v600_v58 = vadd.f32 %v885_v63, %v442_v38 }
 0x1f9   :  { %v592_v6 = vadd.f32 %v591_v4, %v432_v36  ;;  %v886_v7 = vpop.f32.mrb[2].mxu0  ;;  %v894_v9 = vpop.f32.mrb[2].mxu1 }
 0x1fa   :  { %v603_v10 = vadd.f32 %v886_v7, %v447_v40  ;;  %v594_v11 = vpop.f32.mrb[3].mxu0  ;;  %v626_v12 = vpop.f32.mrb[3].mxu1  ;;  %v656_v15 = vmax.f32 %v600_v58, 0.0  ;;  %v632_v58 = vadd.f32 %v893_v1, %v482_v49 }
 0x1fb   :  { %v654_v13 = vmax.f32 %v592_v6, 0.0  ;;  %v595_v14 = vadd.f32 %v594_v11, %v437_v34  ;;  %v624_v34 = vadd.f32 %v623_v5, %v472_v46  ;;  %v627_v63 = vadd.f32 %v626_v12, %v477_v48 }
 0x1fc   :  { %v657_v18 = vmax.f32 %v603_v10, 0.0  ;;  %v768_v24 = vmul.f32 %v699_v44, %v656_v15  ;;  %v664_v5 = vmax.f32 %v632_v58, 0.0 }
 0x1fd   :  { %v655_v16 = vmax.f32 %v595_v14, 0.0  ;;  %v766_v19 = vmul.f32 %v689_v42, %v654_v13  ;;  %v810_v42 = vpop.permute.xlu0 %809  ;;  %v662_v6 = vmax.f32 %v624_v34, 0.0  ;;  %v822_v34 = vstv %s850_s2 }
 0x1fe   :  { %v769_v30 = vmul.f32 %v704_v47, %v657_v18  ;;  %v812_v10 = vmul.f32 %v810_v42, %v1203_v62  ;;  %v776_v62 = vmul.f32 %v739_v17, %v664_v5 }
 0x1ff   :  { %v767_v20 = vmul.f32 %v694_v37, %v655_v16  ;;  %v889_v0 = vpop.f32.mrb[4].mxu0  ;;  %v897_v21 = vpop.f32.mrb[4].mxu1  ;;  %v774_v11 = vmul.f32 %v1350_v57, %v662_v6 }
 0x200   :  { %v607_v22 = vpop.f32.mrb[5].mxu0  ;;  %v639_v23 = vpop.f32.mrb[5].mxu1  ;;  %v616_v26 = vadd.f32 %v889_v0, %v462_v41  ;;  %v814_v13 = vsel %vm813_vm0, %v812_v10, 0.0 }
 0x201   :  { %v782_v25 = vadd.f32 %v767_v20, %v766_v19  ;;  %v608_v27 = vadd.f32 %v607_v22, %v452_v35  ;;  %v890_v28 = vpop.f32.mrb[6].mxu0  ;;  %v898_v29 = vpop.f32.mrb[6].mxu1  ;;  %v640_v48 = vadd.f32 %v639_v23, %v1346_v54  ;;  %v815_v15 = vrot.slane %v814_v13, 4 }
 0x202   :  { %v610_v31 = vpop.f32.mrb[7].mxu0  ;;  %v642_v2 = vpop.f32.mrb[7].mxu1  ;;  %v619_v32 = vadd.f32 %v890_v28, %v467_v43  ;;  %v660_v36 = vmax.f32 %v616_v26, 0.0  ;;  %v663_v43 = vmax.f32 %v627_v63, 0.0  ;;  %v651_v57 = vadd.f32 %v898_v29, %v1356_v61 }
 0x203   :  { %v783_v3 = vadd.f32 %v782_v25, %v768_v24  ;;  %v658_v8 = vmax.f32 %v608_v27, 0.0  ;;  %v611_v33 = vadd.f32 %v610_v31, %v457_v39  ;;  %v744_v35 = vpop.permute.xlu1 %743  ;;  %v635_v39 = vadd.f32 %v894_v9, %v1344_v51 }
 0x204   :  { %v661_v4 = vmax.f32 %v619_v32, 0.0  ;;  %v772_v47 = vmul.f32 %v719_v53, %v660_v36  ;;  %v775_v53 = vmul.f32 %v1354_v60, %v663_v43  ;;  %v643_v14 = vadd.f32 %v642_v2, %v1348_v56 }
 0x205   :  { %v770_v37 = vmul.f32 %v709_v52, %v658_v8  ;;  %v784_v38 = vadd.f32 %v783_v3, %v769_v30  ;;  %v659_v40 = vmax.f32 %v611_v33, 0.0  ;;  %v665_v49 = vmax.f32 %v635_v39, 0.0 }
 0x206   :  { %v773_v46 = vmul.f32 %v724_v55, %v661_v4  ;;  %v648_v51 = vadd.f32 %v897_v21, %v1352_v59  ;;  %v666_v9 = vmax.f32 %v640_v48, 0.0  ;;  %v667_v18 = vmax.f32 %v643_v14, 0.0 }
 0x207   :  { %v785_v44 = vadd.f32 %v784_v38, %v770_v37  ;;  %v771_v41 = vmul.f32 %v714_v50, %v659_v40  ;;  %v749_v50 = vpop.permute.xlu1 %748  ;;  %v777_v16 = vmul.f32 %v744_v35, %v665_v49  ;;  %v816_v23 = vadd.f32 %v815_v15, %v814_v13 }
 0x208   :  { %v668_v20 = vmax.f32 %v648_v51, 0.0  ;;  %v778_v0 = vmul.f32 %v749_v50, %v666_v9  ;;  %v669_v60 = vmax.f32 %v651_v57, 0.0  ;;  %v804_v33 = vstv %s803_s3 }
 0x209   :  { %v786_v7 = vadd.f32 %v785_v44, %v771_v41  ;;  %v817_v21 = vrot.slane %v816_v23, 2 }
 0x20a   :  { %v780_v56 = vmul.f32 %v1358_v45, %v668_v20 }
 0x20b   :  { %v787_v52 = vadd.f32 %v786_v7, %v772_v47  ;;  %v754_v19 = vpop.permute.xlu1 %753  ;;  %v818_v30 = vadd.f32 %v817_v21, %v816_v23 }
 0x20c   :  { %v779_v24 = vmul.f32 %v754_v19, %v667_v18 }
 0x20d   :  { %v788_v12 = vadd.f32 %v787_v52, %v773_v46  ;;  %v819_v31 = vrot.slane %v818_v30, 1 }
 0x20f   :  { %v789_v1 = vadd.f32 %v788_v12, %v774_v11  ;;  %v764_v59 = vpop.permute.xlu1 %763  ;;  %v820_v32 = vadd.f32 %v819_v31, %v818_v30 }
 0x210   :  { %v781_v26 = vmul.f32 %v764_v59, %v669_v60 }
 0x211   :  { %v790_v55 = vadd.f32 %v789_v1, %v775_v53  ;;  %v823_v37 = vadd.f32 %v822_v34, %v820_v32 }
 0x213   :  { %v791_v54 = vadd.f32 %v790_v55, %v776_v62 }
 0x215   :  { %v792_v22 = vadd.f32 %v791_v54, %v777_v16 }
 0x217   :  { %v793_v25 = vadd.f32 %v792_v22, %v778_v0 }
 0x219   :  { %v794_v17 = vadd.f32 %v793_v25, %v779_v24 }
 0x21b   :  { %v795_v27 = vadd.f32 %v794_v17, %v780_v56 }
 0x21d   :  { %v796_v28 = vadd.f32 %v795_v27, %v781_v26 }
 0x21f   :  { %v797_v61 = vrot.slane %v796_v28, 4 }
 0x221   :  { %v798_v29 = vadd.f32 %v797_v61, %v796_v28 }
 0x223   :  { %v799_v2 = vrot.slane %v798_v29, 2 }
 0x225   :  { %v800_v3 = vadd.f32 %v799_v2, %v798_v29 }
 0x227   :  { %v801_v8 = vrot.slane %v800_v3, 1 }
 0x229   :  { %v802_v36 = vadd.f32 %v801_v8, %v800_v3 }
 0x22b   :  { %v805_v45 = vadd.f32 %v804_v33, %v802_v36 }
 0x22d   :  { %v825_v38 = vsel %vm824_vm1, %v805_v45, %v823_v37 }
 0x22e   :  { %826 = vst [vmem:[#allocation5] sm:$0x3] %v825_v38 }
 0x22f   :  { %970 = shalt.err (!%p967_p9)
}
 0x230   :  { %s971_s12 = scalar_lea.hbm %s1389_s8, 32 }
 0x231   :  { %p972_p10 = scmp.ne.s32.totalorder %s1389_s8, %s971_s12  ;;  %p975_p11 = scmp.lt.u32.totalorder %s971_s12, %s1389_s8 }
 0x233   :  { %p977_p12 = pnand %p975_p11, %p972_p10 }
 0x235   :  { %980 = shalt.err (!%p977_p12)
}
 0x236   :  { %836 = dma.vmem_to_hbm [thread:$0]  %s834_s30, 32, %s1389_s8, [#allocation3]  }
 0x237   :  { %983 = dma.done.wait [#allocation3], 32  }
 0x238   :  { %984 = vsyncadd [#allocation3], 4294967264 }
 0x239   :  { %840 = vsyncpa [#allocation3], 1 }
 0x23a   :  { %841 = vsyncpa [#allocation4], 1 }

</bundles_post_ra>
